<compile_context>
chip_gen: v5e
topology: v5e:2x2
jax: 0.10.0
libtpu: 0.0.40
codegen_flags: <defaults>
</compile_context>

<pallas_src>
import functools
import math

import jax
import jax.numpy as jnp
from jax.experimental import pallas as pl
from jax.experimental.pallas import tpu as pltpu

_HIGH = jax.lax.Precision.HIGHEST


# ---------------------------------------------------------------------------
# Shared math helpers (used by both the Pallas kernel and the pure-JAX reference)
# ---------------------------------------------------------------------------
def _gelu(x):
    c = math.sqrt(2.0 / math.pi)
    return 0.5 * x * (1.0 + jnp.tanh(c * (x + 0.044715 * (x * x * x))))


def _layernorm(x, gamma, beta, eps=1e-12):
    mean = jnp.mean(x, axis=-1, keepdims=True)
    var = jnp.mean(jnp.square(x - mean), axis=-1, keepdims=True)
    return (x - mean) * jax.lax.rsqrt(var + eps) * gamma + beta


# ---------------------------------------------------------------------------
# In-kernel grouped 1x1 conv == grouped Linear.
# w_ref: (groups, Cin/g, Cout/g) bf16, pre-transposed on the host; x: (S, Cin) f32.
# Statically unrolled per-group dot_general, f32 accumulation on the MXU.
# ---------------------------------------------------------------------------
def _grouped_linear(x, w_ref, bias):
    g, cin_g, _ = w_ref.shape
    xb = x.astype(w_ref.dtype)          # bf16 operands for the MXU
    outs = []
    for i in range(g):                  # static unroll over groups (<= 4 in practice)
        outs.append(jax.lax.dot_general(
            xb[:, i * cin_g:(i + 1) * cin_g], w_ref[i],
            (((1,), (0,)), ((), ())),
            preferred_element_type=jnp.float32))
    y = outs[0] if g == 1 else jnp.concatenate(outs, axis=-1)
    return y + bias                     # bias add in f32


# ---------------------------------------------------------------------------
# Fused kernel for one SqueezeBertModule (one encoder layer), one batch element
# ---------------------------------------------------------------------------
def _squeezebert_module_kernel(
    x_ref, mask_ref,
    wq_ref, wk_ref, wv_ref, wpa_ref, wi_ref, wo_ref,
    vec_ref,                     # (9, H) f32: [bq*scale, bk, bv, b_post, ln1_g, ln1_b, b_out, ln2_g, ln2_b]
    bi_ref,                      # (1, I) f32
    out_ref,
    ctx_scratch,                 # (S, H) f32 VMEM scratch for the attention context
    *, num_heads,
):
    x = x_ref[0]                 # (S, H) hidden states for this batch element
    mask = mask_ref[0]           # (1, S) additive attention mask
    vecs = vec_ref[...]          # (9, H)

    seq, hidden = x.shape
    dh = hidden // num_heads

    # --- SqueezeBertSelfAttention ------------------------------------------
    # 1/sqrt(dh) is already folded into wq / bq on the host.
    q = _grouped_linear(x, wq_ref, vecs[0:1])    # (S, H) f32
    k = _grouped_linear(x, wk_ref, vecs[1:2])
    v = _grouped_linear(x, wv_ref, vecs[2:3])

    for h in range(num_heads):                   # static unroll over heads
        sl = slice(h * dh, (h + 1) * dh)
        qh = q[:, sl].astype(jnp.bfloat16)
        kh = k[:, sl].astype(jnp.bfloat16)
        vh = v[:, sl].astype(jnp.bfloat16)
        # scores[s, t] = sum_d q[s, d] * k[t, d]  (scale pre-folded into q)
        scores = jax.lax.dot_general(
            qh, kh, (((1,), (1,)), ((), ())),
            preferred_element_type=jnp.float32)           # (S, S) f32
        scores = scores + mask
        m = jnp.max(scores, axis=-1, keepdims=True)
        p = jnp.exp(scores - m)                           # unnormalized probs, f32
        denom = jnp.sum(p, axis=-1, keepdims=True)
        ctx = jax.lax.dot_general(                        # PV with bf16 operands
            p.astype(jnp.bfloat16), vh, (((1,), (0,)), ((), ())),
            preferred_element_type=jnp.float32)           # (S, dh) f32
        # Deferred softmax normalization (EUP reciprocal), written to lane offset.
        ctx_scratch[:, sl] = ctx * pl.reciprocal(denom, approx=True)

    context = ctx_scratch[...]                            # (S, H) f32

    # --- post_attention: conv + (dropout = id) + residual + LayerNorm -------
    pa = _grouped_linear(context, wpa_ref, vecs[3:4])
    y = _layernorm(pa + x, vecs[4:5], vecs[5:6])

    # --- intermediate: conv + GELU -------------------------------------------
    inter = _gelu(_grouped_linear(y, wi_ref, bi_ref[...]))

    # --- output: conv + (dropout = id) + residual + LayerNorm ----------------
    o = _grouped_linear(inter, wo_ref, vecs[6:7])
    out = _layernorm(o + y, vecs[7:8], vecs[8:9])

    out_ref[0] = out.astype(out_ref.dtype)


# ---------------------------------------------------------------------------
# Host-side weight preparation (done once per layer)
# ---------------------------------------------------------------------------
def _group_split_transpose(w, groups):
    """PyTorch Conv1d weight (Cout, Cin//groups, 1) -> (groups, Cin//groups, Cout//groups)."""
    cout, cin_g, _ = w.shape
    co = cout // groups
    w2 = w[:, :, 0].reshape(groups, co, cin_g)   # group-major PyTorch out-channel order
    return jnp.transpose(w2, (0, 2, 1))          # pre-transposed: y_g = x_g @ w_g


def prepare_layer_for_kernel(raw, hidden_size, intermediate_size, num_heads,
                             weight_dtype=jnp.bfloat16):
    dh = hidden_size // num_heads
    scale = 1.0 / math.sqrt(dh)

    def w(name, gkey, extra_scale=1.0):
        return (_group_split_transpose(raw[name], raw[gkey]) * extra_scale).astype(weight_dtype)

    vecs_h = jnp.stack([
        raw["bq"] * scale,                       # scale folded into the query path
        raw["bk"], raw["bv"], raw["b_post"],
        raw["ln1_g"], raw["ln1_b"],
        raw["b_out"], raw["ln2_g"], raw["ln2_b"],
    ]).astype(jnp.float32)                       # (9, H)

    return dict(
        wq=w("wq", "q_groups", scale),
        wk=w("wk", "k_groups"),
        wv=w("wv", "v_groups"),
        w_post=w("w_post", "post_groups"),
        w_inter=w("w_inter", "inter_groups"),
        w_out=w("w_out", "out_groups"),
        vecs_h=vecs_h,
        b_inter=raw["b_inter"].reshape(1, -1).astype(jnp.float32),
    )


# ---------------------------------------------------------------------------
# Per-layer and full-encoder wrappers
# ---------------------------------------------------------------------------
def squeezebert_module_forward(x, attention_mask, params, num_heads):
    """x: (B, S, H); attention_mask: (B, S) additive; params: prepared kernel weights."""
    B, S, H = x.shape
    mask3 = attention_mask.reshape(B, 1, S).astype(jnp.float32)

    weights = (params["wq"], params["wk"], params["wv"],
               params["w_post"], params["w_inter"], params["w_out"],
               params["vecs_h"], params["b_inter"])

    def resident(a):  # weights / biases stay VMEM-resident across the batch grid
        return pl.BlockSpec(a.shape, lambda b: (0,) * a.ndim)

    in_specs = [
        pl.BlockSpec((1, S, H), lambda b: (b, 0, 0)),   # hidden states, per-batch block
        pl.BlockSpec((1, 1, S), lambda b: (b, 0, 0)),   # additive attention mask
    ] + [resident(a) for a in weights]

    kernel = functools.partial(_squeezebert_module_kernel, num_heads=num_heads)
    return pl.pallas_call(
        kernel,
        out_shape=jax.ShapeDtypeStruct((B, S, H), x.dtype),
        grid_spec=pltpu.PrefetchScalarGridSpec(
            num_scalar_prefetch=0,
            grid=(B,),
            in_specs=in_specs,
            out_specs=pl.BlockSpec((1, S, H), lambda b: (b, 0, 0)),
            scratch_shapes=[pltpu.VMEM((S, H), jnp.float32)],
        ),
        compiler_params=pltpu.CompilerParams(
            dimension_semantics=("parallel",),          # batch axis shards across TCs
            vmem_limit_bytes=64 * 1024 * 1024,          # above 16/32 MiB defaults, <= v7x physical
        ),
    )(x, mask3, *weights)


def squeezebert_encoder_forward(hidden_states, attention_mask, layer_params, num_heads):
    """Pallas equivalent of SqueezeBertEncoder.forward (default flags; last_hidden_state)."""
    B, S, H = hidden_states.shape
    if attention_mask is None:
        attention_mask = jnp.zeros((B, S), dtype=jnp.float32)
    x = hidden_states
    for p in layer_params:
        x = squeezebert_module_forward(x, attention_mask, p, num_heads)
    return x


# ---------------------------------------------------------------------------
# Pure-JAX reference (mirrors the PyTorch math, f32, raw grouped conv weights)
# ---------------------------------------------------------------------------
def _grouped_conv1x1_ref(x, w, b, groups):
    # x: (B, S, Cin); w: (Cout, Cin//groups, 1); b: (Cout,)
    cin, cout = x.shape[-1], w.shape[0]
    ci, co = cin // groups, cout // groups
    outs = []
    for g in range(groups):
        xg = x[..., g * ci:(g + 1) * ci]
        wg = w[g * co:(g + 1) * co, :, 0]
        outs.append(jnp.einsum("bsc,oc->bso", xg, wg, precision=_HIGH))
    return jnp.concatenate(outs, axis=-1) + b


def squeezebert_encoder_ref(hidden_states, attention_mask, raw_layers, num_heads):
    x = hidden_states
    B, S, H = x.shape
    dh = H // num_heads
    for p in raw_layers:
        q = _grouped_conv1x1_ref(x, p["wq"], p["bq"], p["q_groups"])
        k = _grouped_conv1x1_ref(x, p["wk"], p["bk"], p["k_groups"])
        v = _grouped_conv1x1_ref(x, p["wv"], p["bv"], p["v_groups"])
        qh = q.reshape(B, S, num_heads, dh).transpose(0, 2, 1, 3)
        kh = k.reshape(B, S, num_heads, dh).transpose(0, 2, 1, 3)
        vh = v.reshape(B, S, num_heads, dh).transpose(0, 2, 1, 3)
        scores = jnp.einsum("bhqd,bhkd->bhqk", qh, kh, precision=_HIGH) / math.sqrt(dh)
        scores = scores + attention_mask[:, None, None, :]
        probs = jax.nn.softmax(scores, axis=-1)
        ctx = jnp.einsum("bhqk,bhkd->bhqd", probs, vh, precision=_HIGH)
        ctx = ctx.transpose(0, 2, 1, 3).reshape(B, S, H)
        pa = _grouped_conv1x1_ref(ctx, p["w_post"], p["b_post"], p["post_groups"])
        y = _layernorm(pa + x, p["ln1_g"], p["ln1_b"])
        inter = _gelu(_grouped_conv1x1_ref(y, p["w_inter"], p["b_inter"], p["inter_groups"]))
        o = _grouped_conv1x1_ref(inter, p["w_out"], p["b_out"], p["out_groups"])
        x = _layernorm(o + y, p["ln2_g"], p["ln2_b"])
    return x


# ---------------------------------------------------------------------------
if __name__ == "__main__":
    B, S, H, I = 2, 8, 32, 64
    NUM_HEADS, NUM_LAYERS = 4, 2
    Q_GROUPS = K_GROUPS = V_GROUPS = 2
    POST_GROUPS, INTER_GROUPS, OUT_GROUPS = 1, 2, 2

    key = jax.random.PRNGKey(0)
    keys = iter(jax.random.split(key, 128))

    def nrm(shape, scale=0.1):
        return scale * jax.random.normal(next(keys), shape, dtype=jnp.float32)

    hidden_states = nrm((B, S, H), 1.0)
    attention_mask = jnp.zeros((B, S), dtype=jnp.float32)
    attention_mask = attention_mask.at[1, S - 2:].set(-10000.0)  # mask last 2 tokens of batch 1

    raw_layers = []
    for _ in range(NUM_LAYERS):
        raw_layers.append(dict(
            wq=nrm((H, H // Q_GROUPS, 1)), bq=nrm((H,)), q_groups=Q_GROUPS,
            wk=nrm((H, H // K_GROUPS, 1)), bk=nrm((H,)), k_groups=K_GROUPS,
            wv=nrm((H, H // V_GROUPS, 1)), bv=nrm((H,)), v_groups=V_GROUPS,
            w_post=nrm((H, H // POST_GROUPS, 1)), b_post=nrm((H,)), post_groups=POST_GROUPS,
            ln1_g=1.0 + nrm((H,), 0.05), ln1_b=nrm((H,), 0.05),
            w_inter=nrm((I, H // INTER_GROUPS, 1)), b_inter=nrm((I,)), inter_groups=INTER_GROUPS,
            w_out=nrm((H, I // OUT_GROUPS, 1)), b_out=nrm((H,)), out_groups=OUT_GROUPS,
            ln2_g=1.0 + nrm((H,), 0.05), ln2_b=nrm((H,), 0.05),
        ))

    kernel_layers = [prepare_layer_for_kernel(p, H, I, NUM_HEADS) for p in raw_layers]

    out = squeezebert_encoder_forward(hidden_states, attention_mask, kernel_layers, NUM_HEADS)
    out = jax.block_until_ready(out)

    ref = squeezebert_encoder_ref(hidden_states, attention_mask, raw_layers, NUM_HEADS)
    assert out.shape == (B, S, H)
    # bf16 MXU operands vs f32 reference -> slightly looser tolerance than pure f32.
    assert jnp.allclose(out, ref, atol=2e-2, rtol=2e-2), (
        "mismatch vs reference, max abs diff = %s" % jnp.max(jnp.abs(out - ref)))
    print("KERNEL_OK")
</pallas_src>

<mosaic_0001>
module attributes {stable_mosaic.version = 11 : i64} {
  func.func @_squeezebert_module_kernel(%arg0: i32, %arg1: memref<1x8x32xf32, #tpu.memory_space<vmem>>, %arg2: memref<1x1x8xf32, #tpu.memory_space<vmem>>, %arg3: memref<2x16x16xbf16, #tpu.memory_space<vmem>>, %arg4: memref<2x16x16xbf16, #tpu.memory_space<vmem>>, %arg5: memref<2x16x16xbf16, #tpu.memory_space<vmem>>, %arg6: memref<1x32x32xbf16, #tpu.memory_space<vmem>>, %arg7: memref<2x16x32xbf16, #tpu.memory_space<vmem>>, %arg8: memref<2x32x16xbf16, #tpu.memory_space<vmem>>, %arg9: memref<9x32xf32, #tpu.memory_space<vmem>>, %arg10: memref<1x64xf32, #tpu.memory_space<vmem>>, %arg11: memref<1x8x32xf32, #tpu.memory_space<vmem>>, %arg12: memref<8x32xf32, #tpu.memory_space<vmem>>) attributes {dimension_semantics = [#tpu.dimension_semantics<parallel>], iteration_bounds = array<i64: 2>, scalar_prefetch = 0 : i64, scratch_operands = 1 : i64, tpu.core_type = #tpu.core_type<tc>, window_params = [{transform_indices = @transform_0, window_bounds = array<i64: 1, 8, 32>}, {transform_indices = @transform_1, window_bounds = array<i64: 1, 1, 8>}, {pipeline_mode = #tpu.pipeline_mode<synchronous>, transform_indices = @transform_2, window_bounds = array<i64: 2, 16, 16>}, {pipeline_mode = #tpu.pipeline_mode<synchronous>, transform_indices = @transform_3, window_bounds = array<i64: 2, 16, 16>}, {pipeline_mode = #tpu.pipeline_mode<synchronous>, transform_indices = @transform_4, window_bounds = array<i64: 2, 16, 16>}, {pipeline_mode = #tpu.pipeline_mode<synchronous>, transform_indices = @transform_5, window_bounds = array<i64: 1, 32, 32>}, {pipeline_mode = #tpu.pipeline_mode<synchronous>, transform_indices = @transform_6, window_bounds = array<i64: 2, 16, 32>}, {pipeline_mode = #tpu.pipeline_mode<synchronous>, transform_indices = @transform_7, window_bounds = array<i64: 2, 32, 16>}, {pipeline_mode = #tpu.pipeline_mode<synchronous>, transform_indices = @transform_8, window_bounds = array<i64: 9, 32>}, {pipeline_mode = #tpu.pipeline_mode<synchronous>, transform_indices = @transform_9, window_bounds = array<i64: 1, 64>}, {transform_indices = @transform_10, window_bounds = array<i64: 1, 8, 32>}]} {
    %c0 = arith.constant 0 : index
    %c0_0 = arith.constant 0 : index
    %c0_1 = arith.constant 0 : index
    %0 = vector.load %arg1[%c0, %c0_0, %c0_1] : memref<1x8x32xf32, #tpu.memory_space<vmem>>, vector<1x8x32xf32>
    %1 = vector.shape_cast %0 : vector<1x8x32xf32> to vector<8x32xf32>
    %c0_2 = arith.constant 0 : index
    %c0_3 = arith.constant 0 : index
    %c0_4 = arith.constant 0 : index
    %2 = vector.load %arg2[%c0_2, %c0_3, %c0_4] : memref<1x1x8xf32, #tpu.memory_space<vmem>>, vector<1x1x8xf32>
    %3 = vector.shape_cast %2 : vector<1x1x8xf32> to vector<1x8xf32>
    %c0_5 = arith.constant 0 : index
    %c0_6 = arith.constant 0 : index
    %4 = vector.load %arg9[%c0_5, %c0_6] : memref<9x32xf32, #tpu.memory_space<vmem>>, vector<9x32xf32>
    %5 = vector.extract_strided_slice %4 {offsets = [0, 0], sizes = [1, 32], strides = [1, 1]} : vector<9x32xf32> to vector<1x32xf32>
    %6 = arith.truncf %1 : vector<8x32xf32> to vector<8x32xbf16>
    %7 = vector.extract_strided_slice %6 {offsets = [0, 0], sizes = [8, 16], strides = [1, 1]} : vector<8x32xbf16> to vector<8x16xbf16>
    %c0_7 = arith.constant 0 : index
    %c0_8 = arith.constant 0 : index
    %c0_9 = arith.constant 0 : index
    %8 = vector.load %arg3[%c0_7, %c0_8, %c0_9] : memref<2x16x16xbf16, #tpu.memory_space<vmem>>, vector<1x16x16xbf16>
    %9 = vector.shape_cast %8 : vector<1x16x16xbf16> to vector<16x16xbf16>
    %cst = arith.constant dense<0.000000e+00> : vector<8x16xf32>
    %10 = tpu.matmul %7, %9, %cst {dimension_numbers = #tpu.dot_dimension_numbers<[1], [0], [0], [1], [0, 0, 1, 1], [], []>} : vector<8x16xbf16>, vector<16x16xbf16>, vector<8x16xf32> -> vector<8x16xf32>
    %11 = vector.extract_strided_slice %6 {offsets = [0, 16], sizes = [8, 16], strides = [1, 1]} : vector<8x32xbf16> to vector<8x16xbf16>
    %c1 = arith.constant 1 : index
    %c0_10 = arith.constant 0 : index
    %c0_11 = arith.constant 0 : index
    %12 = vector.load %arg3[%c1, %c0_10, %c0_11] : memref<2x16x16xbf16, #tpu.memory_space<vmem>>, vector<1x16x16xbf16>
    %13 = vector.shape_cast %12 : vector<1x16x16xbf16> to vector<16x16xbf16>
    %cst_12 = arith.constant dense<0.000000e+00> : vector<8x16xf32>
    %14 = tpu.matmul %11, %13, %cst_12 {dimension_numbers = #tpu.dot_dimension_numbers<[1], [0], [0], [1], [0, 0, 1, 1], [], []>} : vector<8x16xbf16>, vector<16x16xbf16>, vector<8x16xf32> -> vector<8x16xf32>
    %15 = tpu.concatenate %10, %14 in 1 : vector<8x16xf32>, vector<8x16xf32> -> vector<8x32xf32>
    %16 = vector.broadcast %5 : vector<1x32xf32> to vector<8x32xf32>
    %17 = arith.addf %15, %16 : vector<8x32xf32>
    %18 = vector.extract_strided_slice %4 {offsets = [1, 0], sizes = [1, 32], strides = [1, 1]} : vector<9x32xf32> to vector<1x32xf32>
    %19 = arith.truncf %1 : vector<8x32xf32> to vector<8x32xbf16>
    %20 = vector.extract_strided_slice %19 {offsets = [0, 0], sizes = [8, 16], strides = [1, 1]} : vector<8x32xbf16> to vector<8x16xbf16>
    %c0_13 = arith.constant 0 : index
    %c0_14 = arith.constant 0 : index
    %c0_15 = arith.constant 0 : index
    %21 = vector.load %arg4[%c0_13, %c0_14, %c0_15] : memref<2x16x16xbf16, #tpu.memory_space<vmem>>, vector<1x16x16xbf16>
    %22 = vector.shape_cast %21 : vector<1x16x16xbf16> to vector<16x16xbf16>
    %cst_16 = arith.constant dense<0.000000e+00> : vector<8x16xf32>
    %23 = tpu.matmul %20, %22, %cst_16 {dimension_numbers = #tpu.dot_dimension_numbers<[1], [0], [0], [1], [0, 0, 1, 1], [], []>} : vector<8x16xbf16>, vector<16x16xbf16>, vector<8x16xf32> -> vector<8x16xf32>
    %24 = vector.extract_strided_slice %19 {offsets = [0, 16], sizes = [8, 16], strides = [1, 1]} : vector<8x32xbf16> to vector<8x16xbf16>
    %c1_17 = arith.constant 1 : index
    %c0_18 = arith.constant 0 : index
    %c0_19 = arith.constant 0 : index
    %25 = vector.load %arg4[%c1_17, %c0_18, %c0_19] : memref<2x16x16xbf16, #tpu.memory_space<vmem>>, vector<1x16x16xbf16>
    %26 = vector.shape_cast %25 : vector<1x16x16xbf16> to vector<16x16xbf16>
    %cst_20 = arith.constant dense<0.000000e+00> : vector<8x16xf32>
    %27 = tpu.matmul %24, %26, %cst_20 {dimension_numbers = #tpu.dot_dimension_numbers<[1], [0], [0], [1], [0, 0, 1, 1], [], []>} : vector<8x16xbf16>, vector<16x16xbf16>, vector<8x16xf32> -> vector<8x16xf32>
    %28 = tpu.concatenate %23, %27 in 1 : vector<8x16xf32>, vector<8x16xf32> -> vector<8x32xf32>
    %29 = vector.broadcast %18 : vector<1x32xf32> to vector<8x32xf32>
    %30 = arith.addf %28, %29 : vector<8x32xf32>
    %31 = vector.extract_strided_slice %4 {offsets = [2, 0], sizes = [1, 32], strides = [1, 1]} : vector<9x32xf32> to vector<1x32xf32>
    %32 = arith.truncf %1 : vector<8x32xf32> to vector<8x32xbf16>
    %33 = vector.extract_strided_slice %32 {offsets = [0, 0], sizes = [8, 16], strides = [1, 1]} : vector<8x32xbf16> to vector<8x16xbf16>
    %c0_21 = arith.constant 0 : index
    %c0_22 = arith.constant 0 : index
    %c0_23 = arith.constant 0 : index
    %34 = vector.load %arg5[%c0_21, %c0_22, %c0_23] : memref<2x16x16xbf16, #tpu.memory_space<vmem>>, vector<1x16x16xbf16>
    %35 = vector.shape_cast %34 : vector<1x16x16xbf16> to vector<16x16xbf16>
    %cst_24 = arith.constant dense<0.000000e+00> : vector<8x16xf32>
    %36 = tpu.matmul %33, %35, %cst_24 {dimension_numbers = #tpu.dot_dimension_numbers<[1], [0], [0], [1], [0, 0, 1, 1], [], []>} : vector<8x16xbf16>, vector<16x16xbf16>, vector<8x16xf32> -> vector<8x16xf32>
    %37 = vector.extract_strided_slice %32 {offsets = [0, 16], sizes = [8, 16], strides = [1, 1]} : vector<8x32xbf16> to vector<8x16xbf16>
    %c1_25 = arith.constant 1 : index
    %c0_26 = arith.constant 0 : index
    %c0_27 = arith.constant 0 : index
    %38 = vector.load %arg5[%c1_25, %c0_26, %c0_27] : memref<2x16x16xbf16, #tpu.memory_space<vmem>>, vector<1x16x16xbf16>
    %39 = vector.shape_cast %38 : vector<1x16x16xbf16> to vector<16x16xbf16>
    %cst_28 = arith.constant dense<0.000000e+00> : vector<8x16xf32>
    %40 = tpu.matmul %37, %39, %cst_28 {dimension_numbers = #tpu.dot_dimension_numbers<[1], [0], [0], [1], [0, 0, 1, 1], [], []>} : vector<8x16xbf16>, vector<16x16xbf16>, vector<8x16xf32> -> vector<8x16xf32>
    %41 = tpu.concatenate %36, %40 in 1 : vector<8x16xf32>, vector<8x16xf32> -> vector<8x32xf32>
    %42 = vector.broadcast %31 : vector<1x32xf32> to vector<8x32xf32>
    %43 = arith.addf %41, %42 : vector<8x32xf32>
    %44 = vector.extract_strided_slice %17 {offsets = [0, 0], sizes = [8, 8], strides = [1, 1]} : vector<8x32xf32> to vector<8x8xf32>
    %45 = arith.truncf %44 : vector<8x8xf32> to vector<8x8xbf16>
    %46 = vector.extract_strided_slice %30 {offsets = [0, 0], sizes = [8, 8], strides = [1, 1]} : vector<8x32xf32> to vector<8x8xf32>
    %47 = arith.truncf %46 : vector<8x8xf32> to vector<8x8xbf16>
    %48 = vector.extract_strided_slice %43 {offsets = [0, 0], sizes = [8, 8], strides = [1, 1]} : vector<8x32xf32> to vector<8x8xf32>
    %49 = arith.truncf %48 : vector<8x8xf32> to vector<8x8xbf16>
    %cst_29 = arith.constant dense<0.000000e+00> : vector<8x8xf32>
    %50 = tpu.matmul %45, %47, %cst_29 {dimension_numbers = #tpu.dot_dimension_numbers<[1], [1], [0], [0], [0, 0, 1, 0], [], []>} : vector<8x8xbf16>, vector<8x8xbf16>, vector<8x8xf32> -> vector<8x8xf32>
    %51 = vector.broadcast %3 : vector<1x8xf32> to vector<8x8xf32>
    %52 = arith.addf %50, %51 : vector<8x8xf32>
    %cst_30 = arith.constant dense<0xFF800000> : vector<8xf32>
    %53 = vector.multi_reduction <maximumf>, %52, %cst_30 [1] : vector<8x8xf32> to vector<8xf32>
    %54 = vector.shape_cast %53 : vector<8xf32> to vector<8x1xf32>
    %55 = vector.broadcast %54 : vector<8x1xf32> to vector<8x8xf32>
    %56 = arith.subf %52, %55 : vector<8x8xf32>
    %57 = math.exp %56 : vector<8x8xf32>
    %cst_31 = arith.constant dense<0.000000e+00> : vector<8xf32>
    %58 = vector.multi_reduction <add>, %57, %cst_31 [1] : vector<8x8xf32> to vector<8xf32>
    %59 = vector.shape_cast %58 : vector<8xf32> to vector<8x1xf32>
    %60 = arith.truncf %57 : vector<8x8xf32> to vector<8x8xbf16>
    %cst_32 = arith.constant dense<0.000000e+00> : vector<8x8xf32>
    %61 = tpu.matmul %60, %49, %cst_32 {dimension_numbers = #tpu.dot_dimension_numbers<[1], [0], [0], [1], [0, 0, 1, 1], [], []>} : vector<8x8xbf16>, vector<8x8xbf16>, vector<8x8xf32> -> vector<8x8xf32>
    %62 = tpu.reciprocal %59 {approx = true} : vector<8x1xf32> -> vector<8x1xf32>
    %63 = vector.broadcast %62 : vector<8x1xf32> to vector<8x8xf32>
    %64 = arith.mulf %61, %63 : vector<8x8xf32>
    %c0_33 = arith.constant 0 : index
    %c0_34 = arith.constant 0 : index
    %65 = vector.load %arg12[%c0_33, %c0_34] : memref<8x32xf32, #tpu.memory_space<vmem>>, vector<8x8xf32>
    tpu.vector_store %arg12[%c0_33, %c0_34], %64 {strides = array<i32>} : memref<8x32xf32, #tpu.memory_space<vmem>>, vector<8x8xf32>,
    %66 = vector.extract_strided_slice %17 {offsets = [0, 8], sizes = [8, 8], strides = [1, 1]} : vector<8x32xf32> to vector<8x8xf32>
    %67 = arith.truncf %66 : vector<8x8xf32> to vector<8x8xbf16>
    %68 = vector.extract_strided_slice %30 {offsets = [0, 8], sizes = [8, 8], strides = [1, 1]} : vector<8x32xf32> to vector<8x8xf32>
    %69 = arith.truncf %68 : vector<8x8xf32> to vector<8x8xbf16>
    %70 = vector.extract_strided_slice %43 {offsets = [0, 8], sizes = [8, 8], strides = [1, 1]} : vector<8x32xf32> to vector<8x8xf32>
    %71 = arith.truncf %70 : vector<8x8xf32> to vector<8x8xbf16>
    %cst_35 = arith.constant dense<0.000000e+00> : vector<8x8xf32>
    %72 = tpu.matmul %67, %69, %cst_35 {dimension_numbers = #tpu.dot_dimension_numbers<[1], [1], [0], [0], [0, 0, 1, 0], [], []>} : vector<8x8xbf16>, vector<8x8xbf16>, vector<8x8xf32> -> vector<8x8xf32>
    %73 = vector.broadcast %3 : vector<1x8xf32> to vector<8x8xf32>
    %74 = arith.addf %72, %73 : vector<8x8xf32>
    %cst_36 = arith.constant dense<0xFF800000> : vector<8xf32>
    %75 = vector.multi_reduction <maximumf>, %74, %cst_36 [1] : vector<8x8xf32> to vector<8xf32>
    %76 = vector.shape_cast %75 : vector<8xf32> to vector<8x1xf32>
    %77 = vector.broadcast %76 : vector<8x1xf32> to vector<8x8xf32>
    %78 = arith.subf %74, %77 : vector<8x8xf32>
    %79 = math.exp %78 : vector<8x8xf32>
    %cst_37 = arith.constant dense<0.000000e+00> : vector<8xf32>
    %80 = vector.multi_reduction <add>, %79, %cst_37 [1] : vector<8x8xf32> to vector<8xf32>
    %81 = vector.shape_cast %80 : vector<8xf32> to vector<8x1xf32>
    %82 = arith.truncf %79 : vector<8x8xf32> to vector<8x8xbf16>
    %cst_38 = arith.constant dense<0.000000e+00> : vector<8x8xf32>
    %83 = tpu.matmul %82, %71, %cst_38 {dimension_numbers = #tpu.dot_dimension_numbers<[1], [0], [0], [1], [0, 0, 1, 1], [], []>} : vector<8x8xbf16>, vector<8x8xbf16>, vector<8x8xf32> -> vector<8x8xf32>
    %84 = tpu.reciprocal %81 {approx = true} : vector<8x1xf32> -> vector<8x1xf32>
    %85 = vector.broadcast %84 : vector<8x1xf32> to vector<8x8xf32>
    %86 = arith.mulf %83, %85 : vector<8x8xf32>
    %c0_39 = arith.constant 0 : index
    %c8 = arith.constant 8 : index
    %87 = vector.load %arg12[%c0_39, %c8] : memref<8x32xf32, #tpu.memory_space<vmem>>, vector<8x8xf32>
    tpu.vector_store %arg12[%c0_39, %c8], %86 {strides = array<i32>} : memref<8x32xf32, #tpu.memory_space<vmem>>, vector<8x8xf32>,
    %88 = vector.extract_strided_slice %17 {offsets = [0, 16], sizes = [8, 8], strides = [1, 1]} : vector<8x32xf32> to vector<8x8xf32>
    %89 = arith.truncf %88 : vector<8x8xf32> to vector<8x8xbf16>
    %90 = vector.extract_strided_slice %30 {offsets = [0, 16], sizes = [8, 8], strides = [1, 1]} : vector<8x32xf32> to vector<8x8xf32>
    %91 = arith.truncf %90 : vector<8x8xf32> to vector<8x8xbf16>
    %92 = vector.extract_strided_slice %43 {offsets = [0, 16], sizes = [8, 8], strides = [1, 1]} : vector<8x32xf32> to vector<8x8xf32>
    %93 = arith.truncf %92 : vector<8x8xf32> to vector<8x8xbf16>
    %cst_40 = arith.constant dense<0.000000e+00> : vector<8x8xf32>
    %94 = tpu.matmul %89, %91, %cst_40 {dimension_numbers = #tpu.dot_dimension_numbers<[1], [1], [0], [0], [0, 0, 1, 0], [], []>} : vector<8x8xbf16>, vector<8x8xbf16>, vector<8x8xf32> -> vector<8x8xf32>
    %95 = vector.broadcast %3 : vector<1x8xf32> to vector<8x8xf32>
    %96 = arith.addf %94, %95 : vector<8x8xf32>
    %cst_41 = arith.constant dense<0xFF800000> : vector<8xf32>
    %97 = vector.multi_reduction <maximumf>, %96, %cst_41 [1] : vector<8x8xf32> to vector<8xf32>
    %98 = vector.shape_cast %97 : vector<8xf32> to vector<8x1xf32>
    %99 = vector.broadcast %98 : vector<8x1xf32> to vector<8x8xf32>
    %100 = arith.subf %96, %99 : vector<8x8xf32>
    %101 = math.exp %100 : vector<8x8xf32>
    %cst_42 = arith.constant dense<0.000000e+00> : vector<8xf32>
    %102 = vector.multi_reduction <add>, %101, %cst_42 [1] : vector<8x8xf32> to vector<8xf32>
    %103 = vector.shape_cast %102 : vector<8xf32> to vector<8x1xf32>
    %104 = arith.truncf %101 : vector<8x8xf32> to vector<8x8xbf16>
    %cst_43 = arith.constant dense<0.000000e+00> : vector<8x8xf32>
    %105 = tpu.matmul %104, %93, %cst_43 {dimension_numbers = #tpu.dot_dimension_numbers<[1], [0], [0], [1], [0, 0, 1, 1], [], []>} : vector<8x8xbf16>, vector<8x8xbf16>, vector<8x8xf32> -> vector<8x8xf32>
    %106 = tpu.reciprocal %103 {approx = true} : vector<8x1xf32> -> vector<8x1xf32>
    %107 = vector.broadcast %106 : vector<8x1xf32> to vector<8x8xf32>
    %108 = arith.mulf %105, %107 : vector<8x8xf32>
    %c0_44 = arith.constant 0 : index
    %c16 = arith.constant 16 : index
    %109 = vector.load %arg12[%c0_44, %c16] : memref<8x32xf32, #tpu.memory_space<vmem>>, vector<8x8xf32>
    tpu.vector_store %arg12[%c0_44, %c16], %108 {strides = array<i32>} : memref<8x32xf32, #tpu.memory_space<vmem>>, vector<8x8xf32>,
    %110 = vector.extract_strided_slice %17 {offsets = [0, 24], sizes = [8, 8], strides = [1, 1]} : vector<8x32xf32> to vector<8x8xf32>
    %111 = arith.truncf %110 : vector<8x8xf32> to vector<8x8xbf16>
    %112 = vector.extract_strided_slice %30 {offsets = [0, 24], sizes = [8, 8], strides = [1, 1]} : vector<8x32xf32> to vector<8x8xf32>
    %113 = arith.truncf %112 : vector<8x8xf32> to vector<8x8xbf16>
    %114 = vector.extract_strided_slice %43 {offsets = [0, 24], sizes = [8, 8], strides = [1, 1]} : vector<8x32xf32> to vector<8x8xf32>
    %115 = arith.truncf %114 : vector<8x8xf32> to vector<8x8xbf16>
    %cst_45 = arith.constant dense<0.000000e+00> : vector<8x8xf32>
    %116 = tpu.matmul %111, %113, %cst_45 {dimension_numbers = #tpu.dot_dimension_numbers<[1], [1], [0], [0], [0, 0, 1, 0], [], []>} : vector<8x8xbf16>, vector<8x8xbf16>, vector<8x8xf32> -> vector<8x8xf32>
    %117 = vector.broadcast %3 : vector<1x8xf32> to vector<8x8xf32>
    %118 = arith.addf %116, %117 : vector<8x8xf32>
    %cst_46 = arith.constant dense<0xFF800000> : vector<8xf32>
    %119 = vector.multi_reduction <maximumf>, %118, %cst_46 [1] : vector<8x8xf32> to vector<8xf32>
    %120 = vector.shape_cast %119 : vector<8xf32> to vector<8x1xf32>
    %121 = vector.broadcast %120 : vector<8x1xf32> to vector<8x8xf32>
    %122 = arith.subf %118, %121 : vector<8x8xf32>
    %123 = math.exp %122 : vector<8x8xf32>
    %cst_47 = arith.constant dense<0.000000e+00> : vector<8xf32>
    %124 = vector.multi_reduction <add>, %123, %cst_47 [1] : vector<8x8xf32> to vector<8xf32>
    %125 = vector.shape_cast %124 : vector<8xf32> to vector<8x1xf32>
    %126 = arith.truncf %123 : vector<8x8xf32> to vector<8x8xbf16>
    %cst_48 = arith.constant dense<0.000000e+00> : vector<8x8xf32>
    %127 = tpu.matmul %126, %115, %cst_48 {dimension_numbers = #tpu.dot_dimension_numbers<[1], [0], [0], [1], [0, 0, 1, 1], [], []>} : vector<8x8xbf16>, vector<8x8xbf16>, vector<8x8xf32> -> vector<8x8xf32>
    %128 = tpu.reciprocal %125 {approx = true} : vector<8x1xf32> -> vector<8x1xf32>
    %129 = vector.broadcast %128 : vector<8x1xf32> to vector<8x8xf32>
    %130 = arith.mulf %127, %129 : vector<8x8xf32>
    %c0_49 = arith.constant 0 : index
    %c24 = arith.constant 24 : index
    %131 = vector.load %arg12[%c0_49, %c24] : memref<8x32xf32, #tpu.memory_space<vmem>>, vector<8x8xf32>
    tpu.vector_store %arg12[%c0_49, %c24], %130 {strides = array<i32>} : memref<8x32xf32, #tpu.memory_space<vmem>>, vector<8x8xf32>,
    %c0_50 = arith.constant 0 : index
    %c0_51 = arith.constant 0 : index
    %132 = vector.load %arg12[%c0_50, %c0_51] : memref<8x32xf32, #tpu.memory_space<vmem>>, vector<8x32xf32>
    %133 = vector.extract_strided_slice %4 {offsets = [3, 0], sizes = [1, 32], strides = [1, 1]} : vector<9x32xf32> to vector<1x32xf32>
    %134 = arith.truncf %132 : vector<8x32xf32> to vector<8x32xbf16>
    %c0_52 = arith.constant 0 : index
    %c0_53 = arith.constant 0 : index
    %c0_54 = arith.constant 0 : index
    %135 = vector.load %arg6[%c0_52, %c0_53, %c0_54] : memref<1x32x32xbf16, #tpu.memory_space<vmem>>, vector<1x32x32xbf16>
    %136 = vector.shape_cast %135 : vector<1x32x32xbf16> to vector<32x32xbf16>
    %cst_55 = arith.constant dense<0.000000e+00> : vector<8x32xf32>
    %137 = tpu.matmul %134, %136, %cst_55 {dimension_numbers = #tpu.dot_dimension_numbers<[1], [0], [0], [1], [0, 0, 1, 1], [], []>} : vector<8x32xbf16>, vector<32x32xbf16>, vector<8x32xf32> -> vector<8x32xf32>
    %138 = vector.broadcast %133 : vector<1x32xf32> to vector<8x32xf32>
    %139 = arith.addf %137, %138 : vector<8x32xf32>
    %140 = arith.addf %139, %1 : vector<8x32xf32>
    %141 = vector.extract_strided_slice %4 {offsets = [4, 0], sizes = [1, 32], strides = [1, 1]} : vector<9x32xf32> to vector<1x32xf32>
    %142 = vector.extract_strided_slice %4 {offsets = [5, 0], sizes = [1, 32], strides = [1, 1]} : vector<9x32xf32> to vector<1x32xf32>
    %cst_56 = arith.constant dense<0.000000e+00> : vector<8xf32>
    %143 = vector.multi_reduction <add>, %140, %cst_56 [1] : vector<8x32xf32> to vector<8xf32>
    %144 = vector.shape_cast %143 : vector<8xf32> to vector<8x1xf32>
    %cst_57 = arith.constant 3.200000e+01 : f32
    %145 = vector.broadcast %cst_57 : f32 to vector<8x1xf32>
    %146 = arith.divf %144, %145 : vector<8x1xf32>
    %147 = vector.broadcast %146 : vector<8x1xf32> to vector<8x32xf32>
    %148 = arith.subf %140, %147 : vector<8x32xf32>
    %149 = arith.mulf %148, %148 : vector<8x32xf32>
    %cst_58 = arith.constant dense<0.000000e+00> : vector<8xf32>
    %150 = vector.multi_reduction <add>, %149, %cst_58 [1] : vector<8x32xf32> to vector<8xf32>
    %151 = vector.shape_cast %150 : vector<8xf32> to vector<8x1xf32>
    %cst_59 = arith.constant 3.200000e+01 : f32
    %152 = vector.broadcast %cst_59 : f32 to vector<8x1xf32>
    %153 = arith.divf %151, %152 : vector<8x1xf32>
    %154 = vector.broadcast %146 : vector<8x1xf32> to vector<8x32xf32>
    %155 = arith.subf %140, %154 : vector<8x32xf32>
    %cst_60 = arith.constant 9.99999996E-13 : f32
    %156 = vector.broadcast %cst_60 : f32 to vector<8x1xf32>
    %157 = arith.addf %153, %156 : vector<8x1xf32>
    %158 = math.rsqrt %157 : vector<8x1xf32>
    %159 = vector.broadcast %158 : vector<8x1xf32> to vector<8x32xf32>
    %160 = arith.mulf %155, %159 : vector<8x32xf32>
    %161 = vector.broadcast %141 : vector<1x32xf32> to vector<8x32xf32>
    %162 = arith.mulf %160, %161 : vector<8x32xf32>
    %163 = vector.broadcast %142 : vector<1x32xf32> to vector<8x32xf32>
    %164 = arith.addf %162, %163 : vector<8x32xf32>
    %c0_61 = arith.constant 0 : index
    %c0_62 = arith.constant 0 : index
    %165 = vector.load %arg10[%c0_61, %c0_62] : memref<1x64xf32, #tpu.memory_space<vmem>>, vector<1x64xf32>
    %166 = arith.truncf %164 : vector<8x32xf32> to vector<8x32xbf16>
    %167 = vector.extract_strided_slice %166 {offsets = [0, 0], sizes = [8, 16], strides = [1, 1]} : vector<8x32xbf16> to vector<8x16xbf16>
    %c0_63 = arith.constant 0 : index
    %c0_64 = arith.constant 0 : index
    %c0_65 = arith.constant 0 : index
    %168 = vector.load %arg7[%c0_63, %c0_64, %c0_65] : memref<2x16x32xbf16, #tpu.memory_space<vmem>>, vector<1x16x32xbf16>
    %169 = vector.shape_cast %168 : vector<1x16x32xbf16> to vector<16x32xbf16>
    %cst_66 = arith.constant dense<0.000000e+00> : vector<8x32xf32>
    %170 = tpu.matmul %167, %169, %cst_66 {dimension_numbers = #tpu.dot_dimension_numbers<[1], [0], [0], [1], [0, 0, 1, 1], [], []>} : vector<8x16xbf16>, vector<16x32xbf16>, vector<8x32xf32> -> vector<8x32xf32>
    %171 = vector.extract_strided_slice %166 {offsets = [0, 16], sizes = [8, 16], strides = [1, 1]} : vector<8x32xbf16> to vector<8x16xbf16>
    %c1_67 = arith.constant 1 : index
    %c0_68 = arith.constant 0 : index
    %c0_69 = arith.constant 0 : index
    %172 = vector.load %arg7[%c1_67, %c0_68, %c0_69] : memref<2x16x32xbf16, #tpu.memory_space<vmem>>, vector<1x16x32xbf16>
    %173 = vector.shape_cast %172 : vector<1x16x32xbf16> to vector<16x32xbf16>
    %cst_70 = arith.constant dense<0.000000e+00> : vector<8x32xf32>
    %174 = tpu.matmul %171, %173, %cst_70 {dimension_numbers = #tpu.dot_dimension_numbers<[1], [0], [0], [1], [0, 0, 1, 1], [], []>} : vector<8x16xbf16>, vector<16x32xbf16>, vector<8x32xf32> -> vector<8x32xf32>
    %175 = tpu.concatenate %170, %174 in 1 : vector<8x32xf32>, vector<8x32xf32> -> vector<8x64xf32>
    %176 = vector.broadcast %165 : vector<1x64xf32> to vector<8x64xf32>
    %177 = arith.addf %175, %176 : vector<8x64xf32>
    %cst_71 = arith.constant 5.000000e-01 : f32
    %178 = vector.broadcast %cst_71 : f32 to vector<8x64xf32>
    %179 = arith.mulf %178, %177 : vector<8x64xf32>
    %180 = arith.mulf %177, %177 : vector<8x64xf32>
    %181 = arith.mulf %180, %177 : vector<8x64xf32>
    %cst_72 = arith.constant 4.471500e-02 : f32
    %182 = vector.broadcast %cst_72 : f32 to vector<8x64xf32>
    %183 = arith.mulf %182, %181 : vector<8x64xf32>
    %184 = arith.addf %177, %183 : vector<8x64xf32>
    %cst_73 = arith.constant 0.797884583 : f32
    %185 = vector.broadcast %cst_73 : f32 to vector<8x64xf32>
    %186 = arith.mulf %185, %184 : vector<8x64xf32>
    %187 = math.tanh %186 : vector<8x64xf32>
    %cst_74 = arith.constant 1.000000e+00 : f32
    %188 = vector.broadcast %cst_74 : f32 to vector<8x64xf32>
    %189 = arith.addf %188, %187 : vector<8x64xf32>
    %190 = arith.mulf %179, %189 : vector<8x64xf32>
    %191 = vector.extract_strided_slice %4 {offsets = [6, 0], sizes = [1, 32], strides = [1, 1]} : vector<9x32xf32> to vector<1x32xf32>
    %192 = arith.truncf %190 : vector<8x64xf32> to vector<8x64xbf16>
    %193 = vector.extract_strided_slice %192 {offsets = [0, 0], sizes = [8, 32], strides = [1, 1]} : vector<8x64xbf16> to vector<8x32xbf16>
    %c0_75 = arith.constant 0 : index
    %c0_76 = arith.constant 0 : index
    %c0_77 = arith.constant 0 : index
    %194 = vector.load %arg8[%c0_75, %c0_76, %c0_77] : memref<2x32x16xbf16, #tpu.memory_space<vmem>>, vector<1x32x16xbf16>
    %195 = vector.shape_cast %194 : vector<1x32x16xbf16> to vector<32x16xbf16>
    %cst_78 = arith.constant dense<0.000000e+00> : vector<8x16xf32>
    %196 = tpu.matmul %193, %195, %cst_78 {dimension_numbers = #tpu.dot_dimension_numbers<[1], [0], [0], [1], [0, 0, 1, 1], [], []>} : vector<8x32xbf16>, vector<32x16xbf16>, vector<8x16xf32> -> vector<8x16xf32>
    %197 = vector.extract_strided_slice %192 {offsets = [0, 32], sizes = [8, 32], strides = [1, 1]} : vector<8x64xbf16> to vector<8x32xbf16>
    %c1_79 = arith.constant 1 : index
    %c0_80 = arith.constant 0 : index
    %c0_81 = arith.constant 0 : index
    %198 = vector.load %arg8[%c1_79, %c0_80, %c0_81] : memref<2x32x16xbf16, #tpu.memory_space<vmem>>, vector<1x32x16xbf16>
    %199 = vector.shape_cast %198 : vector<1x32x16xbf16> to vector<32x16xbf16>
    %cst_82 = arith.constant dense<0.000000e+00> : vector<8x16xf32>
    %200 = tpu.matmul %197, %199, %cst_82 {dimension_numbers = #tpu.dot_dimension_numbers<[1], [0], [0], [1], [0, 0, 1, 1], [], []>} : vector<8x32xbf16>, vector<32x16xbf16>, vector<8x16xf32> -> vector<8x16xf32>
    %201 = tpu.concatenate %196, %200 in 1 : vector<8x16xf32>, vector<8x16xf32> -> vector<8x32xf32>
    %202 = vector.broadcast %191 : vector<1x32xf32> to vector<8x32xf32>
    %203 = arith.addf %201, %202 : vector<8x32xf32>
    %204 = arith.addf %203, %164 : vector<8x32xf32>
    %205 = vector.extract_strided_slice %4 {offsets = [7, 0], sizes = [1, 32], strides = [1, 1]} : vector<9x32xf32> to vector<1x32xf32>
    %206 = vector.extract_strided_slice %4 {offsets = [8, 0], sizes = [1, 32], strides = [1, 1]} : vector<9x32xf32> to vector<1x32xf32>
    %cst_83 = arith.constant dense<0.000000e+00> : vector<8xf32>
    %207 = vector.multi_reduction <add>, %204, %cst_83 [1] : vector<8x32xf32> to vector<8xf32>
    %208 = vector.shape_cast %207 : vector<8xf32> to vector<8x1xf32>
    %cst_84 = arith.constant 3.200000e+01 : f32
    %209 = vector.broadcast %cst_84 : f32 to vector<8x1xf32>
    %210 = arith.divf %208, %209 : vector<8x1xf32>
    %211 = vector.broadcast %210 : vector<8x1xf32> to vector<8x32xf32>
    %212 = arith.subf %204, %211 : vector<8x32xf32>
    %213 = arith.mulf %212, %212 : vector<8x32xf32>
    %cst_85 = arith.constant dense<0.000000e+00> : vector<8xf32>
    %214 = vector.multi_reduction <add>, %213, %cst_85 [1] : vector<8x32xf32> to vector<8xf32>
    %215 = vector.shape_cast %214 : vector<8xf32> to vector<8x1xf32>
    %cst_86 = arith.constant 3.200000e+01 : f32
    %216 = vector.broadcast %cst_86 : f32 to vector<8x1xf32>
    %217 = arith.divf %215, %216 : vector<8x1xf32>
    %218 = vector.broadcast %210 : vector<8x1xf32> to vector<8x32xf32>
    %219 = arith.subf %204, %218 : vector<8x32xf32>
    %cst_87 = arith.constant 9.99999996E-13 : f32
    %220 = vector.broadcast %cst_87 : f32 to vector<8x1xf32>
    %221 = arith.addf %217, %220 : vector<8x1xf32>
    %222 = math.rsqrt %221 : vector<8x1xf32>
    %223 = vector.broadcast %222 : vector<8x1xf32> to vector<8x32xf32>
    %224 = arith.mulf %219, %223 : vector<8x32xf32>
    %225 = vector.broadcast %205 : vector<1x32xf32> to vector<8x32xf32>
    %226 = arith.mulf %224, %225 : vector<8x32xf32>
    %227 = vector.broadcast %206 : vector<1x32xf32> to vector<8x32xf32>
    %228 = arith.addf %226, %227 : vector<8x32xf32>
    %c0_88 = arith.constant 0 : index
    %c0_89 = arith.constant 0 : index
    %c0_90 = arith.constant 0 : index
    %229 = vector.load %arg11[%c0_88, %c0_89, %c0_90] : memref<1x8x32xf32, #tpu.memory_space<vmem>>, vector<1x8x32xf32>
    %230 = vector.shape_cast %229 : vector<1x8x32xf32> to vector<8x32xf32>
    %231 = vector.shape_cast %228 : vector<8x32xf32> to vector<1x8x32xf32>
    tpu.vector_store %arg11[%c0_88, %c0_89, %c0_90], %231 {strides = array<i32>} : memref<1x8x32xf32, #tpu.memory_space<vmem>>, vector<1x8x32xf32>,
    return
  }
  func.func @transform_0(%arg0: i32) -> (i32, i32, i32) {
    %c0_i32 = arith.constant 0 : i32
    %c0_i32_0 = arith.constant 0 : i32
    %c0_i32_1 = arith.constant 0 : i32
    return %arg0, %c0_i32, %c0_i32_0 : i32, i32, i32
  }
  func.func @transform_1(%arg0: i32) -> (i32, i32, i32) {
    %c0_i32 = arith.constant 0 : i32
    %c0_i32_0 = arith.constant 0 : i32
    %c0_i32_1 = arith.constant 0 : i32
    return %arg0, %c0_i32, %c0_i32_0 : i32, i32, i32
  }
  func.func @transform_2(%arg0: i32) -> (i32, i32, i32) {
    %c0_i32 = arith.constant 0 : i32
    %c0_i32_0 = arith.constant 0 : i32
    %c0_i32_1 = arith.constant 0 : i32
    %c0_i32_2 = arith.constant 0 : i32
    return %c0_i32, %c0_i32_0, %c0_i32_1 : i32, i32, i32
  }
  func.func @transform_3(%arg0: i32) -> (i32, i32, i32) {
    %c0_i32 = arith.constant 0 : i32
    %c0_i32_0 = arith.constant 0 : i32
    %c0_i32_1 = arith.constant 0 : i32
    %c0_i32_2 = arith.constant 0 : i32
    return %c0_i32, %c0_i32_0, %c0_i32_1 : i32, i32, i32
  }
  func.func @transform_4(%arg0: i32) -> (i32, i32, i32) {
    %c0_i32 = arith.constant 0 : i32
    %c0_i32_0 = arith.constant 0 : i32
    %c0_i32_1 = arith.constant 0 : i32
    %c0_i32_2 = arith.constant 0 : i32
    return %c0_i32, %c0_i32_0, %c0_i32_1 : i32, i32, i32
  }
  func.func @transform_5(%arg0: i32) -> (i32, i32, i32) {
    %c0_i32 = arith.constant 0 : i32
    %c0_i32_0 = arith.constant 0 : i32
    %c0_i32_1 = arith.constant 0 : i32
    %c0_i32_2 = arith.constant 0 : i32
    return %c0_i32, %c0_i32_0, %c0_i32_1 : i32, i32, i32
  }
  func.func @transform_6(%arg0: i32) -> (i32, i32, i32) {
    %c0_i32 = arith.constant 0 : i32
    %c0_i32_0 = arith.constant 0 : i32
    %c0_i32_1 = arith.constant 0 : i32
    %c0_i32_2 = arith.constant 0 : i32
    return %c0_i32, %c0_i32_0, %c0_i32_1 : i32, i32, i32
  }
  func.func @transform_7(%arg0: i32) -> (i32, i32, i32) {
    %c0_i32 = arith.constant 0 : i32
    %c0_i32_0 = arith.constant 0 : i32
    %c0_i32_1 = arith.constant 0 : i32
    %c0_i32_2 = arith.constant 0 : i32
    return %c0_i32, %c0_i32_0, %c0_i32_1 : i32, i32, i32
  }
  func.func @transform_8(%arg0: i32) -> (i32, i32) {
    %c0_i32 = arith.constant 0 : i32
    %c0_i32_0 = arith.constant 0 : i32
    %c0_i32_1 = arith.constant 0 : i32
    return %c0_i32, %c0_i32_0 : i32, i32
  }
  func.func @transform_9(%arg0: i32) -> (i32, i32) {
    %c0_i32 = arith.constant 0 : i32
    %c0_i32_0 = arith.constant 0 : i32
    %c0_i32_1 = arith.constant 0 : i32
    return %c0_i32, %c0_i32_0 : i32, i32
  }
  func.func @transform_10(%arg0: i32) -> (i32, i32, i32) {
    %c0_i32 = arith.constant 0 : i32
    %c0_i32_0 = arith.constant 0 : i32
    %c0_i32_1 = arith.constant 0 : i32
    return %arg0, %c0_i32, %c0_i32_0 : i32, i32, i32
  }
}

</mosaic_0001>

<bundles_post_ra>
// kernel: tpu_custom_call.1
= control target key start
LH: loop header
LB: loop body
LE: loop exit
PB: predicated region body
PF: predicated region fallthrough
CT: control target
= control target key end

     0   :  { %s2079_s0 = inlined_call_operand.vmem [shape: f32[2,8,32], index: 0, kind: input, shape index: {}]   ;;  %s2080_s1 = inlined_call_operand.hbm [shape: f32[2,1,8], index: 1, kind: input, shape index: {}]   ;;  %s2081_s2 = inlined_call_operand.vmem [shape: bf16[2,16,16], index: 2, kind: input, shape index: {}]   ;;  %s2082_s3 = inlined_call_operand.vmem [shape: bf16[2,16,16], index: 3, kind: input, shape index: {}]   ;;  %s2083_s4 = inlined_call_operand.hbm [shape: bf16[2,16,16], index: 4, kind: input, shape index: {}]   ;;  %s2084_s5 = inlined_call_operand.hbm [shape: bf16[1,32,32], index: 5, kind: input, shape index: {}]   ;;  %s2085_s6 = inlined_call_operand.hbm [shape: bf16[2,16,32], index: 6, kind: input, shape index: {}]   ;;  %s2086_s7 = inlined_call_operand.vmem [shape: bf16[2,32,16], index: 7, kind: input, shape index: {}]   ;;  %s2087_s8 = inlined_call_operand.hbm [shape: f32[9,32], index: 8, kind: input, shape index: {}]   ;;  %s2088_s9 = inlined_call_operand.vmem [shape: f32[1,64], index: 9, kind: input, shape index: {}]   ;;  %s2089_s10 = inlined_call_operand.hbm [shape: f32[2,8,32], index: 10, kind: output, shape index: {}]  }
   0x1   :  { %2090 = sst [smem:[#allocation17_spill]] %s2083_s4 }
   0x2   :  { %2091 = sst [smem:[#allocation18_spill]] %s2084_s5 }
   0x3   :  { %2092 = sst [smem:[#allocation19_spill]] %s2085_s6 }
   0x4   :  { %15 = vsyncpa [#allocation4], 0 }
   0x5   :  { %17 = vsyncpa [#allocation4 + $0x1], 0 }
   0x6   :  { %18 = vsyncpa [#allocation7], 0 }
   0x7   :  { %19 = vsyncpa [#allocation10], 0 }
   0x8   :  { %20 = vsyncpa [#allocation5], 0 }
   0x9   :  { %22 = vsyncpa [#allocation5 + $0x1], 0  ;;  %s1794_s13 = smov 0   ;;  %s1796_s14 = smov 0  }
   0xa   :  { %s1798_s15 = smov 0   ;;  %s1800_s16 = smov 0  }
   0xb LB: > { %s2093_s4 = sld [smem:[#allocation17_spill]]  ;;  %s1818_s20 = sadd.s32 4294967295, %s1720_s16   ;;  %s1720_s16 = sphi %s1800_s16, %s2107_s16   ;;  %s1716_s15 = sphi %s1798_s15, %s2106_s15   ;;  %s1712_s14 = sphi %s1796_s14, %s2105_s14   ;;  %s1708_s13 = sphi %s1794_s13, %s2104_s13  }
   0xc   : > { %p1255_p0 = scmp.ge.s32.totalorder %s1720_s16, 1  ;;  %p75_p1 = scmp.eq.s32.totalorder %s1818_s20, 0 }
   0xd   : > { %p279_p2 = scmp.lt.s32.totalorder %s1720_s16, 3  ;;  %s1722_s22 = smov [#allocation6]  }
   0xe   : > { %s298_s23 = sshll.u32 %s1722_s22, 4  ;;  %s2095_s6 = sld [smem:[#allocation19_spill]]  ;;  %s299_s23 = int_to_ptr.vmem [resolvable:$true] %s298_s23 }
   0xf   : > { %p1823_p3 = pnand %p1255_p0, %p279_p2  ;;  %s2097_s5 = sld [smem:[#allocation18_spill]] }
  0x10   : > { %s1723_s11 = smov [#allocation9]   ;;  %s1724_s17 = smov 64  }
  0x11   : > { %s296_s19 = sshll.u32 %s2093_s4, 4  ;;  %p1389_p4 = pneg %p1823_p3  ;;  %s297_s19 = int_to_ptr.hbm [resolvable:$true] %s296_s19 }
  0x12   : > { %s326_s12 = sshll.u32 %s1723_s11, 4  ;;  %s1725_s18 = smov 4   ;;  %s327_s12 = int_to_ptr.vmem [resolvable:$true] %s326_s12 }
  0x13   : > { %p1835_p6 = pnand %p1389_p4, %p75_p1  ;;  %s341_s25 = sshll.u32 %s2087_s8, 4  ;;  %s342_s25 = int_to_ptr.hbm [resolvable:$true] %s341_s25 }
  0x14   : > { %s324_s26 = sshll.u32 %s2095_s6, 4  ;;  %s1726_s28 = smov [#allocation8]   ;;  %s325_s26 = int_to_ptr.hbm [resolvable:$true] %s324_s26 }
  0x15   : > { %s310_s30 = sshll.u32 %s2097_s5, 4  ;;  %s312_s29 = sshll.u32 %s1726_s28, 4  ;;  %s311_s30 = int_to_ptr.hbm [resolvable:$true] %s310_s30  ;;  %s313_s29 = int_to_ptr.vmem [resolvable:$true] %s312_s29 }
  0x16   : > { %1392 = dma.hbm_to_vmem [thread:$0]  (!%p1835_p6), %s297_s19, 256, %s299_s23, [#allocation7], %s1724_s17, %s1724_s17, %s1725_s18  }
  0x17   : > { %1398 = dma.hbm_to_vmem [thread:$0]  (!%p1835_p6), %s325_s26, 256, %s327_s12, [#allocation10], %s1724_s17, %s1724_s17, %s1725_s18  }
  0x18   : > { %1395 = dma.hbm_to_vmem [thread:$0]  (!%p1835_p6), %s311_s30, 256, %s313_s29, [#allocation7], %s1724_s17, %s1724_s17, %s1725_s18  }
  0x19   : > { %s1727_s19 = smov [#allocation11]   ;;  %s1728_s26 = smov 128  }
  0x1a   : > { %s343_s23 = sshll.u32 %s1727_s19, 4  ;;  %s1729_s11 = smov 8   ;;  %s344_s23 = int_to_ptr.vmem [resolvable:$true] %s343_s23 }
  0x1b   : > { %1401 = dma.hbm_to_vmem [thread:$0]  (!%p1835_p6), %s342_s25, 256, %s344_s23, [#allocation10], %s1728_s26, %s1728_s26, %s1729_s11  }
  0x1c   : > { %s1254_s12 = sadd.s32 4294967294, %s1720_s16   ;;  %s1855_s22 = sadd.s32 1, %s1720_s16  }
  0x1d   : > { %s58_s24 = ssub.s32 %s1720_s16, %s1855_s22  ;;  %s61_s28 = sadd.s32 1, %s1716_s15 }
  0x1e   : > { %p59_p7 = scmp.eq.s32.totalorder %s58_s24, 0  ;;  %p68_p8 = scmp.ne.s32.totalorder %s1716_s15, %s1712_s14 }
  0x1f   : > { %p69_p9 = scmp.eq.s32.totalorder %s1720_s16, 0  ;;  %p74_p10 = scmp.ne.s32.totalorder %s1712_s14, %s1708_s13 }
  0x20   : > { %s1866_s30 = scalar_select %p59_p7, %s1716_s15, %s61_s28  }
  0x21   : > { %p1868_p11 = por %p69_p9, %p68_p8  ;;  %p1874_p12 = por %p75_p1, %p74_p10 }
  0x22   : > { %p266_p13 = scmp.eq.s32.totalorder %s1818_s20, 1  ;;  %p272_p0 = scmp.eq.s32.totalorder %s1254_s12, 1 }
  0x23   : > { %p1414_p2 = scmp.lt.s32.totalorder %s1720_s16, 2  ;;  %s367_s18 = sand.u32 1, %s1716_s15  }
  0x24   : > { %p1881_p4 = por %p266_p13, %p68_p8  ;;  %p1885_p6 = por %p272_p0, %p74_p10 }
  0x25   : > { %s373_s26 = scalar_lea.hbm %s2080_s1, %s1720_s16  ;;  %s370_s11 = scalar_lea.vmem [#allocation3], %s367_s18 }
  0x26   : > { %s377_s24 = sshll.u32 %s370_s11, 4  ;;  %s375_s28 = sshll.u32 %s373_s26, 4  ;;  %s378_s24 = int_to_ptr.vmem [resolvable:$true] %s377_s24  ;;  %s376_s28 = int_to_ptr.hbm [resolvable:$true] %s375_s28 }
  0x27   : > { %p1895_p7 = pnand %p1414_p2, %p1868_p11  ;;  %s368_s4 = scalar_lea.sflag [#allocation4], %s367_s18 }
  0x28   : > { %s1616_s5 = sshra.s32 %s376_s28, 4  ;;  %s1623_s26 = scalar_lea.hbm %s2080_s1, 2  ;;  %s1617_s5 = int_to_ptr.hbm [resolvable:$true] %s1616_s5 }
  0x29   : > { %s1618_s6 = scalar_lea.hbm %s1617_s5, 1  ;;  %p1620_p9 = pneg %p1895_p7 }
  0x2a   : > { %p1619_p8 = scmp.ne.s32.totalorder %s1617_s5, %s1618_s6  ;;  %p1624_p11 = scmp.lt.s32.totalorder %s1617_s5, %s2080_s1 }
  0x2b   : > { %p1625_p0 = scmp.lt.s32.totalorder %s1623_s26, %s1618_s6 }
  0x2c   : > { %p1621_p10 = pnand %p1620_p9, %p1619_p8 }
  0x2d   : > { %p1626_p2 = por %p1625_p0, %p1624_p11 }
  0x2e   : > { %p1622_p13 = pneg %p1621_p10 }
  0x30   : > { %p1627_p5 = pnand %p1626_p2, %p1622_p13 }
  0x32   : > { %1630 = shalt.err (!%p1627_p5)
}
  0x33   : > { %1405 = dma.hbm_to_vmem [thread:$0]  (!%p1895_p7), %s376_s28, 16, %s378_s24, %s368_s4  }
  0x34   : > { %386 = sbr.rel (%p1823_p3) target bundleno = 2541 (0x9ed), region = 60  ;;  %s1912_s18 = sand.u32 (!%p1823_p3), 1, %s1712_s14  }
  0x35   : > { %s389_s19 = scalar_lea.sflag (!%p1823_p3), [#allocation4], %s1912_s18  ;;  %s391_s23 = scalar_lea.vmem (!%p1823_p3), [#allocation3], %s1912_s18 }
  0x39   : > { %1691 = dma.done.wait (%p1874_p12), %s389_s19, 16  }
  0x3a   : > { %1693 = vsyncadd (%p1874_p12), %s389_s19, 4294967280 }
  0x3b   : > { %1695 = dma.done.wait (%p75_p1), [#allocation7], 512  }
  0x3c   : > { %1697 = vsyncadd (%p75_p1), [#allocation7], 4294966784 }
  0x3d   : > { %1699 = dma.done.wait (%p75_p1), [#allocation10], 512  }
  0x3e   : > { %1701 = vsyncadd (%p75_p1), [#allocation10], 4294966784  ;;  %p452_p3 = scmp.lt.s32.totalorder %s1818_s20, 1  ;;  %v1356_v1 = vld [vmem:[%s2081_s2 + $0x8] sm:$0xff]  ;;  %s1730_s11 = smov 112   ;;  %v1360_v6 = vld [vmem:[#allocation6 + $0x8] sm:$0xff] }
  0x3f   : > { %v1358_v2 = vld [vmem:[%s2082_s3 + $0x8] sm:$0xff]  ;;  %511 = vmatpush.bf16.msra.mxu1 %v1356_v1  ;;  %v1357_v7 = vld [vmem:[%s2082_s3] sm:$0xff]  ;;  %vm470_vm0 = vcmask 130048   ;;  %s1731_s6 = smov 16   ;;  %vm630_vm1 = vcmask 64512   ;;  %s1732_s21 = smov 120  }
  0x40   : > { %s453_s4 = scalar_select %p452_p3, %s1818_s20, 1  ;;  %561 = vmatpush.bf16.msra.mxu3 %v1358_v2  ;;  %v1355_v8 = vld [vmem:[%s2081_s2] sm:$0xff]  ;;  %539 = vmatpush.bf16.msra.mxu2 %v1357_v7  ;;  %v1359_v10 = vld [vmem:[#allocation6] sm:$0xff]  ;;  %vm663_vm2 = vcmask 1043456   ;;  %vm746_vm3 = vcmask 130112   ;;  %vm808_vm4 = vcmask 195712  }
  0x41   : > { %481 = vmatpush.bf16.msra.mxu0 %v1355_v8  ;;  %v1958_v21 = vld [vmem:[#allocation11] sm:$0xff]  ;;  %s1735_s24 = smov 24   ;;  %vm870_vm5 = vcmask 261312   ;;  %vm891_vm6 = vcmask 261120   ;;  %s1737_s28 = smov 32  }
  0x42   : > { %s1267_s5 = sshll.u32 %s453_s4, 3  ;;  %v522_v22 = vperm.slane %v1958_v21, 0  ;;  %v572_v27 = vperm.slane %v1958_v21, 1  ;;  %v622_v39 = vperm.slane %v1958_v21, 2  ;;  %v1469_v49 = vld [vmem:[%s391_s23] ss:$0 sm:$0xff] }
  0x43   : > { %s455_s27 = scalar_lea.vmem %s2079_s0, %s1267_s5  ;;  %611 = vmatpush.bf16.msrb.mxu1 %v1360_v6  ;;  %s1734_s23 = smov 8  }
  0x44   : > { %v1933_v0 = vld [vmem:[%s455_s27] sm:$0xff]  ;;  %s1733_s27 = smov 104  }
  0x45   : > { %v461_v3 = vpack.c.bf16 %v1933_v0, %v1933_v0  ;;  %589 = vmatpush.bf16.msrb.mxu0 %v1359_v10 }
  0x47   : > { %v491_v4 = vunpack.c.l.b16 %v461_v3  ;;  %1284 = vmatmul.msk.bf16.vlgmr.msra.gmra.mxu2 %vm470_vm0, %v461_v3  ;;  %1272 = vmatmul.msk.bf16.vlgmr.msra.gmra.mxu0 %vm470_vm0, %v461_v3 }
  0x49   : > { %v492_v5 = vpack.c.b16 %v491_v4, %v491_v4 }
  0x4b   : > { %493 = vrot.lane.b32.xlu0 %v492_v5, %s1730_s11 }
  0x57   : > { %1296 = vmatmul.msk.bf16.vlgmr.msrb.gmra.mxu0 %vm470_vm0, %v461_v3 }
  0xbd   : > { %v494_v9 = vpop.permute.xlu0 %493 }
  0xbe   : > { %1279 = vmatmul.msk.bf16.vlgmr.msra.gmra.mxu1 %vm470_vm0, %v494_v9  ;;  %1291 = vmatmul.msk.bf16.vlgmr.msra.gmra.mxu3 %vm470_vm0, %v494_v9 }
  0xc4   : > { %v483_v19 = vpop.f32.mrf.mxu0 }
  0xca   : > { %v541_v11 = vpop.f32.mrf.mxu2 }
  0xcc   : > { %v485_v20 = vpop.f32.mrf.mxu0 }
  0xce   : > { %1301 = vmatmul.msk.bf16.vlgmr.msrb.gmra.mxu1 %vm470_vm0, %v494_v9 }
  0xd2   : > { %v543_v13 = vpop.f32.mrf.mxu2 }
  0xd4   : > { %v591_v33 = vpop.f32.mrf.mxu0 }
  0xdc   : > { %v593_v36 = vpop.f32.mrf.mxu0 }
 0x13b   : > { %v513_v12 = vpop.f32.mrf.mxu1 }
 0x13c   : > { %518 = vrot.lane.b32.xlu1 %v513_v12, %s1731_s6 }
 0x141   : > { %v563_v14 = vpop.f32.mrf.mxu3 }
 0x142   : > { %568 = vrot.lane.b32.xlu0 %v563_v14, %s1731_s6 }
 0x143   : > { %v515_v15 = vpop.f32.mrf.mxu1 }
 0x149   : > { %v565_v16 = vpop.f32.mrf.mxu3 }
 0x14b   : > { %v613_v17 = vpop.f32.mrf.mxu1 }
 0x153   : > { %v615_v18 = vpop.f32.mrf.mxu1 }
 0x1ae   : > { %v519_v23 = vpop.permute.xlu1 %518 }
 0x1af   : > { %v521_v24 = vsel %vm470_vm0, %v483_v19, %v519_v23 }
 0x1b0   : > { %v523_v25 = vadd.f32 %v522_v22, %v521_v24 }
 0x1b2   : > { %v624_v26 = vpack.c.bf16 %v523_v25, %v523_v25 }
 0x1b4   : > { %v569_v28 = vpop.permute.xlu0 %568  ;;  %748 = vrot.lane.b32.xlu0 %v624_v26, %s1730_s11 }
 0x1b5   : > { %v571_v29 = vsel %vm470_vm0, %v541_v11, %v569_v28 }
 0x1b6   : > { %v573_v30 = vadd.f32 %v572_v27, %v571_v29 }
 0x1b8   : > { %v625_v31 = vpack.c.bf16 %v573_v30, %v573_v30 }
 0x1ba   : > { %750 = vrot.lane.b32.xlu2 %v625_v31, %s1730_s11  ;;  %687 = vrot.lane.b32.xlu1 %v625_v31, %s1732_s21  ;;  %v635_v32 = vsel %vm630_vm1, %v625_v31, 0 }
 0x1bb   : > { %644 = vmatpush.bf16.xpose.msrb.mxu2 %v635_v32 }
 0x1bc   : > { %618 = vrot.lane.b32.xlu0 %v613_v17, %s1731_s6 }
 0x1c2   : > { %812 = vrot.lane.b32.xlu1 %v625_v31, %s1733_s27  ;;  %684 = vrot.lane.b32.xlu2 %v624_v26, %s1732_s21 }
 0x1c3   : > { %1302 = vmatmul.msk.bf16.vlgmr.msrb.gmra.mxu2 %vm630_vm1, %v624_v26 }
 0x1ca   : > { %810 = vrot.lane.b32.xlu2 %v624_v26, %s1733_s27 }
 0x214   : > { %v751_v34 = vpop.permute.xlu2 %750 }
 0x215   : > { %v756_v35 = vsel %vm630_vm1, %v751_v34, 0 }
 0x216   : > { %765 = vmatpush.bf16.xpose.msra.mxu2 %v756_v35 }
 0x21c   : > { %v685_v45 = vpop.permute.xlu2 %684 }
 0x224   : > { %v811_v50 = vpop.permute.xlu2 %810 }
 0x226   : > { %v749_v37 = vpop.permute.xlu0 %748 }
 0x227   : > { %1306 = vmatmul.msk.bf16.vlgmr.msra.gmra.mxu2 %vm630_vm1, %v749_v37 }
 0x22c   : > { %v688_v38 = vpop.permute.xlu1 %687 }
 0x22d   : > { %v693_v40 = vsel %vm630_vm1, %v688_v38, 0 }
 0x22e   : > { %702 = vmatpush.bf16.xpose.msra.mxu0 %v693_v40  ;;  %v619_v41 = vpop.permute.xlu0 %618 }
 0x22f   : > { %v621_v42 = vsel %vm470_vm0, %v591_v33, %v619_v41 }
 0x230   : > { %v623_v43 = vadd.f32 %v622_v39, %v621_v42 }
 0x232   : > { %v626_v44 = vpack.c.bf16 %v623_v43, %v623_v43 }
 0x234   : > { %v813_v46 = vpop.permute.xlu1 %812  ;;  %v665_v47 = vsel %vm663_vm2, %v626_v44, 0 }
 0x235   : > { %v818_v48 = vsel %vm630_vm1, %v813_v46, 0  ;;  %674 = vmatpush.bf16.msrb.mxu3 %v665_v47  ;;  %1304 = vmatmul.msk.bf16.vlgmr.msra.gmra.mxu0 %vm630_vm1, %v685_v45 }
 0x236   : > { %827 = vmatpush.bf16.xpose.msrb.mxu0 %v818_v48 }
 0x245   : > { %1308 = vmatmul.msk.bf16.vlgmr.msrb.gmra.mxu0 %vm630_vm1, %v811_v50 }
 0x246   : > { %v646_v51 = vpop.f32.mrf.mxu2 }
 0x247   : > { %v647_v52 = vadd.f32 %v1469_v49, %v646_v51 }
 0x249   : > { %v650_v53 = vsel %vm630_vm1, %v647_v52, -inf }
 0x24a   : > { %651 = vmax.xlane.f32.xlu1 %v650_v53 }
 0x24e   : > { %v648_v54 = vpop.f32.mrf.mxu2 }
 0x2aa   : > { %v767_v55 = vpop.f32.mrf.mxu2 }
 0x2ab   : > { %v768_v56 = vadd.f32 %v1469_v49, %v767_v55 }
 0x2ad   : > { %v771_v57 = vsel %vm630_vm1, %v768_v56, -inf }
 0x2ae   : > { %772 = vmax.xlane.f32.xlu0 %v771_v57 }
 0x2b2   : > { %v704_v58 = vpop.f32.mrf.mxu0  ;;  %v769_v59 = vpop.f32.mrf.mxu2 }
 0x2b3   : > { %v705_v60 = vadd.f32 %v1469_v49, %v704_v58  ;;  %v1361_v58 = vld [vmem:[#allocation8] sm:$0xff] }
 0x2b5   : > { %v708_v61 = vsel %vm630_vm1, %v705_v60, -inf }
 0x2b6   : > { %709 = vmax.xlane.f32.xlu2 %v708_v61 }
 0x2ba   : > { %v706_v62 = vpop.f32.mrf.mxu0 }
 0x2bb   : > { %v878_v62 = vperm.slane %v1958_v21, 3 }
 0x2bd   : > { %v652_v63 = vpop.xlane.xlu1 %651 }
 0x2be   : > { %v653_v1 = vsub.f32 %v647_v52, %v652_v63 }
 0x2c0   : > { %v654_v2 = vmul.f32 1.442695, %v653_v1 }
 0x2c2   : > { %1472 = vpow2.f32 %v654_v2  ;;  %781 = vrot.lane.b32.xlu0 %v626_v44, %s1730_s11  ;;  %v829_v3 = vpop.f32.mrf.mxu0 }
 0x2c3   : > { %v830_v4 = vadd.f32 %v1469_v49, %v829_v3 }
 0x2c5   : > { %v833_v5 = vsel %vm630_vm1, %v830_v4, -inf }
 0x2c6   : > { %834 = vmax.xlane.f32.xlu1 %v833_v5  ;;  %v1736_v5 = vmov 32.0  }
 0x2c8   : > { %v1473_v6 = vpop.eup %1472 }
 0x2c9   : > { %v659_v7 = vpack.c.bf16 %v1473_v6, %v1473_v6  ;;  %v656_v29 = vsel %vm630_vm1, %v1473_v6, 0.0 }
 0x2ca   : > { %v831_v8 = vpop.f32.mrf.mxu0 }
 0x2cb   : > { %1303 = vmatmul.msk.bf16.vlgmr.msrb.gmra.mxu3 %vm630_vm1, %v659_v7 }
 0x2ce   : > { %719 = vrot.lane.b32.xlu2 %v626_v44, %s1732_s21 }
 0x2df   : > { %843 = vrot.lane.b32.xlu1 %v626_v44, %s1733_s27 }
 0x321   : > { %v773_v9 = vpop.xlane.xlu0 %772 }
 0x322   : > { %v774_v10 = vsub.f32 %v768_v56, %v773_v9  ;;  %v1362_v56 = vld [vmem:[#allocation8 + $0x8] sm:$0xff] }
 0x323   : > { %901 = vmatpush.bf16.msrb.mxu2 %v1362_v56 }
 0x324   : > { %v775_v11 = vmul.f32 1.442695, %v774_v10 }
 0x326   : > { %1474 = vpow2.f32 %v775_v11 }
 0x327   : > { %902 = vmatpush.bf16.msrb.mxu2 %v1361_v58 }
 0x329   : > { %v710_v12 = vpop.xlane.xlu2 %709 }
 0x32a   : > { %v711_v13 = vsub.f32 %v705_v60, %v710_v12 }
 0x32c   : > { %v1475_v14 = vpop.eup %1474  ;;  %v712_v15 = vmul.f32 1.442695, %v711_v13 }
 0x32d   : > { %v777_v16 = vsel %vm630_vm1, %v1475_v14, 0.0  ;;  %v780_v25 = vpack.c.bf16 %v1475_v14, %v1475_v14 }
 0x32e   : > { %1476 = vpow2.f32 %v712_v15  ;;  %778 = vadd.xlane.f32.xlu0 %v777_v16  ;;  %v1363_v16 = vld [vmem:[#allocation9] sm:$0xff] }
 0x331   : > { %v720_v17 = vpop.permute.xlu2 %719 }
 0x332   : > { %v725_v18 = vsel %vm663_vm2, %v720_v17, 0 }
 0x333   : > { %734 = vmatpush.bf16.msra.mxu1 %v725_v18 }
 0x334   : > { %v1477_v19 = vpop.eup %1476  ;;  %v782_v20 = vpop.permute.xlu0 %781 }
 0x335   : > { %v717_v22 = vpack.c.bf16 %v1477_v19, %v1477_v19  ;;  %v787_v23 = vsel %vm663_vm2, %v782_v20, 0  ;;  %v714_v24 = vsel %vm630_vm1, %v1477_v19, 0.0  ;;  %v1364_v20 = vld [vmem:[#allocation9 + $0x8] sm:$0xff] }
 0x336   : > { %796 = vmatpush.bf16.msra.mxu3 %v787_v23  ;;  %715 = vadd.xlane.f32.xlu2 %v714_v24 }
 0x337   : > { %1305 = vmatmul.msk.bf16.vlgmr.msra.gmra.mxu1 %vm630_vm1, %v717_v22  ;;  %992 = vmatpush.bf16.msra.mxu0 %v1364_v20 }
 0x339   : > { %1307 = vmatmul.msk.bf16.vlgmr.msra.gmra.mxu3 %vm630_vm1, %v780_v25  ;;  %v835_v26 = vpop.xlane.xlu1 %834 }
 0x33a   : > { %v836_v27 = vsub.f32 %v830_v4, %v835_v26  ;;  %962 = vmatpush.bf16.msrb.mxu3 %v1363_v16 }
 0x33c   : > { %v837_v28 = vmul.f32 1.442695, %v836_v27 }
 0x33e   : > { %1478 = vpow2.f32 %v837_v28  ;;  %657 = vadd.xlane.f32.xlu2 %v656_v29  ;;  %v938_v28 = vperm.slane %v1958_v21, 4 }
 0x344   : > { %v1479_v30 = vpop.eup %1478 }
 0x345   : > { %v839_v31 = vsel %vm630_vm1, %v1479_v30, 0.0  ;;  %v842_v35 = vpack.c.bf16 %v1479_v30, %v1479_v30  ;;  %v940_v30 = vperm.slane %v1958_v21, 5 }
 0x346   : > { %840 = vadd.xlane.f32.xlu1 %v839_v31 }
 0x34e   : > { %v676_v32 = vpop.f32.mrf.mxu3 }
 0x351   : > { %v844_v33 = vpop.permute.xlu1 %843 }
 0x352   : > { %v849_v34 = vsel %vm663_vm2, %v844_v33, 0 }
 0x353   : > { %858 = vmatpush.bf16.msrb.mxu1 %v849_v34 }
 0x356   : > { %v678_v36 = vpop.f32.mrf.mxu3  ;;  %1309 = vmatmul.msk.bf16.vlgmr.msrb.gmra.mxu1 %vm630_vm1, %v842_v35 }
 0x3a1   : > { %v779_v39 = vpop.xlane.xlu0 %778 }
 0x3a9   : > { %v716_v37 = vpop.xlane.xlu2 %715 }
 0x3aa   : > { %1480 = vrcp.f32 %v716_v37 }
 0x3b0   : > { %v1481_v40 = vpop.eup %1480 }
 0x3b1   : > { %v658_v38 = vpop.xlane.xlu2 %657 }
 0x3b2   : > { %1482 = vrcp.f32 %v658_v38 }
 0x3b3   : > { %1484 = vrcp.f32 %v779_v39 }
 0x3b4   : > { %v736_v41 = vpop.f32.mrf.mxu1 }
 0x3b5   : > { %v741_v42 = vmul.f32 %v1481_v40, %v736_v41 }
 0x3b7   : > { %743 = vrot.lane.b32.xlu0 %v741_v42, %s1734_s23  ;;  %v1366_v42 = vld [vmem:[%s2086_s7 + $0x8] sm:$0xff] }
 0x3b8   : > { %v1483_v43 = vpop.eup %1482  ;;  %1042 = vmatpush.bf16.msra.mxu1 %v1366_v42 }
 0x3b9   : > { %v681_v44 = vmul.f32 %v1483_v43, %v676_v32  ;;  %v1485_v45 = vpop.eup %1484  ;;  %v841_v50 = vpop.xlane.xlu1 %840  ;;  %v1365_v43 = vld [vmem:[%s2086_s7] sm:$0xff] }
 0x3ba   : > { %1486 = vrcp.f32 %v841_v50 }
 0x3bb   : > { %682 = vst.msk [vmem:[#allocation2] sm:$0xff] %vm630_vm1, %v681_v44  ;;  %1488 = vrcp.f32 %v1736_v5  ;;  %v1470_v44 = vld [vmem:[%s2088_s9] ss:$0 sm:$0xff] }
 0x3bc   : > { %v738_v46 = vpop.f32.mrf.mxu1  ;;  %v798_v47 = vpop.f32.mrf.mxu3  ;;  %1043 = vmatpush.bf16.msra.mxu1 %v1365_v43 }
 0x3bd   : > { %v803_v48 = vmul.f32 %v1485_v45, %v798_v47  ;;  %v1368_v45 = vld [vmem:[%s2086_s7 + $0x18] sm:$0xff] }
 0x3be   : > { %1080 = vmatpush.bf16.msra.mxu2 %v1368_v45 }
 0x3bf   : > { %805 = vrot.lane.b32.xlu2 %v803_v48, %s1731_s6  ;;  %v1367_v48 = vld [vmem:[%s2086_s7 + $0x10] sm:$0xff] }
 0x3c0   : > { %v1487_v51 = vpop.eup %1486 }
 0x3c1   : > { %v1489_v6 = vpop.eup %1488 }
 0x3c2   : > { %v913_v7 = vmul.f32 32.0, %v1489_v6  ;;  %vm917_vm7 = vweird.f32 %v1489_v6  ;;  %1081 = vmatpush.bf16.msra.mxu2 %v1367_v48 }
 0x3c4   : > { %v800_v49 = vpop.f32.mrf.mxu3  ;;  %v914_v8 = vsub.f32 1.0, %v913_v7 }
 0x3c6   : > { %v915_v9 = vmul.f32 %v1489_v6, %v914_v8 }
 0x3c8   : > { %v916_v10 = vadd.f32 %v1489_v6, %v915_v9 }
 0x3ca   : > { %v2008_v11 = vsel %vm917_vm7, %v1489_v6, %v916_v10 }
 0x3d3   : > { %v860_v52 = vpop.f32.mrf.mxu1 }
 0x3d4   : > { %v865_v53 = vmul.f32 %v1487_v51, %v860_v52 }
 0x3d6   : > { %867 = vrot.lane.b32.xlu1 %v865_v53, %s1735_s24  ;;  %s1738_s24 = smov 96  }
 0x3db   : > { %v862_v54 = vpop.f32.mrf.mxu1 }
 0x419   : > { %v806_v57 = vpop.permute.xlu2 %805 }
 0x429   : > { %v744_v55 = vpop.permute.xlu0 %743 }
 0x42a   : > { %747 = vst.msk [vmem:[#allocation2] sm:$0xff] %vm746_vm3, %v744_v55 }
 0x42b   : > { %809 = vst.msk [vmem:[#allocation2] sm:$0xff] %vm808_vm4, %v806_v57 }
 0x448   : > { %v868_v59 = vpop.permute.xlu1 %867 }
 0x449   : > { %871 = vst.msk [vmem:[#allocation2] sm:$0xff] %vm870_vm5, %v868_v59 }
 0x450   : > { %v872_v60 = vld [vmem:[#allocation2] sm:$0xff] }
 0x451   : > { %v873_v61 = vpack.c.bf16 %v872_v60, %v872_v60 }
 0x453   : > { %1318 = vmatmul.msk.bf16.vlgmr.msrb.gmra.mxu2 %vm891_vm6, %v873_v61 }
 0x4d6   : > { %v904_v63 = vpop.f32.mrf.mxu2 }
 0x4d7   : > { %v905_v1 = vadd.f32 %v904_v63, %v878_v62 }
 0x4d9   : > { %v908_v2 = vadd.f32 %v905_v1, %v1933_v0 }
 0x4db   : > { %v909_v3 = vsel %vm891_vm6, %v908_v2, 0.0 }
 0x4dc   : > { %910 = vadd.xlane.f32.xlu0 %v909_v3 }
 0x4de   : > { %v906_v4 = vpop.f32.mrf.mxu2 }
 0x4df   : > { %v1092_v4 = vperm.slane %v1958_v21, 6 }
 0x54f   : > { %v911_v12 = vpop.xlane.xlu0 %910 }
 0x550   : > { %v919_v13 = vmul.f32 %v2008_v11, %v911_v12 }
 0x552   : > { %v920_v14 = vsub.f32 %v908_v2, %v919_v13 }
 0x554   : > { %v921_v15 = vmul.f32 %v920_v14, %v920_v14 }
 0x556   : > { %v922_v0 = vsel %vm891_vm6, %v921_v15, 0.0 }
 0x557   : > { %923 = vadd.xlane.f32.xlu2 %v922_v0 }
 0x5ca   : > { %v924_v17 = vpop.xlane.xlu2 %923 }
 0x5cb   : > { %v925_v18 = vmul.f32 %v924_v17, %v2008_v11 }
 0x5cd   : > { %v926_v19 = vadd.f32 1e-12, %v925_v18 }
 0x5cf   : > { %1490 = vrsqrt.f32 %v926_v19  ;;  %vm933_vm9 = vweird.f32 %v926_v19 }
 0x5d5   : > { %v1491_v22 = vpop.eup %1490 }
 0x5d6   : > { %v928_v23 = vmul.f32 %v1491_v22, %v926_v19  ;;  %vm934_vm8 = vweird.f32 %v1491_v22 }
 0x5d7   : > { %vm935_vm10 = vmor %vm933_vm9, %vm934_vm8 }
 0x5d8   : > { %v929_v24 = vmul.f32 %v1491_v22, %v928_v23 }
 0x5da   : > { %v930_v25 = vmul.f32 0.5, %v929_v24 }
 0x5dc   : > { %v931_v26 = vsub.f32 1.5, %v930_v25  ;;  %v1117_v25 = vperm.slane %v1958_v21, 7 }
 0x5de   : > { %v932_v27 = vmul.f32 %v1491_v22, %v931_v26 }
 0x5e0   : > { %v936_v29 = vsel %vm935_vm10, %v1491_v22, %v932_v27  ;;  %v1471_v27 = vld [vmem:[#allocation11 + $0x8] ss:$0 sm:$0xff] }
 0x5e1   : > { %v937_v31 = vmul.f32 %v936_v29, %v920_v14 }
 0x5e3   : > { %v939_v32 = vmul.f32 %v938_v28, %v937_v31 }
 0x5e5   : > { %v941_v33 = vadd.f32 %v940_v30, %v939_v32 }
 0x5e7   : > { %v943_v34 = vpack.c.bf16 %v941_v33, %v941_v33 }
 0x5e9   : > { %1323 = vmatmul.msk.bf16.vlgmr.msrb.gmra.mxu3 %vm470_vm0, %v943_v34  ;;  %v972_v35 = vunpack.c.l.b16 %v943_v34 }
 0x5eb   : > { %v973_v36 = vpack.c.b16 %v972_v35, %v972_v35 }
 0x5ed   : > { %974 = vrot.lane.b32.xlu1 %v973_v36, %s1730_s11 }
 0x65f   : > { %v975_v37 = vpop.permute.xlu1 %974 }
 0x660   : > { %1328 = vmatmul.msk.bf16.vlgmr.msra.gmra.mxu0 %vm470_vm0, %v975_v37 }
 0x66c   : > { %v964_v38 = vpop.f32.mrf.mxu3 }
 0x674   : > { %v966_v39 = vpop.f32.mrf.mxu3 }
 0x6dd   : > { %v994_v40 = vpop.f32.mrf.mxu0 }
 0x6de   : > { %999 = vrot.lane.b32.xlu1 %v994_v40, %s1737_s28  ;;  %s1352_s28 = sshll.u32 %s1818_s20, 3  ;;  %s1123_s20 = scalar_lea.sflag [#allocation5], %s1912_s18 }
 0x6df   : > { %s1133_s17 = scalar_lea.hbm %s2089_s10, %s1352_s28 }
 0x6e0   : > { %s1137_s4 = sshll.u32 %s1133_s17, 4  ;;  %s1138_s4 = int_to_ptr.hbm [resolvable:$true] %s1137_s4 }
 0x6e1   : > { %s1660_s5 = sshra.s32 %s1138_s4, 4  ;;  %s1661_s5 = int_to_ptr.hbm [resolvable:$true] %s1660_s5 }
 0x6e2   : > { %s1662_s21 = scalar_lea.hbm %s1661_s5, 8  ;;  %p1667_p7 = scmp.lt.s32.totalorder %s1661_s5, %s2089_s10 }
 0x6e3   : > { %p1663_p1 = scmp.ne.s32.totalorder %s1661_s5, %s1662_s21 }
 0x6e5   : > { %v996_v41 = vpop.f32.mrf.mxu0  ;;  %p1664_p5 = pnand %p1663_p1, %p1881_p4 }
 0x6e7   : > { %p1665_p12 = pneg %p1664_p5 }
 0x750   : > { %v1000_v46 = vpop.permute.xlu1 %999 }
 0x751   : > { %v1002_v47 = vsel %vm891_vm6, %v964_v38, %v1000_v46 }
 0x752   : > { %v1006_v49 = vadd.f32 %v1470_v44, %v1002_v47 }
 0x754   : > { %v1008_v50 = vmul.f32 %v1006_v49, %v1006_v49  ;;  %v1007_v56 = vmul.f32 0.5, %v1006_v49 }
 0x756   : > { %v1009_v51 = vmul.f32 %v1008_v50, %v1006_v49 }
 0x758   : > { %v1010_v52 = vmul.f32 0.044715, %v1009_v51 }
 0x75a   : > { %v1011_v53 = vadd.f32 %v1010_v52, %v1006_v49 }
 0x75c   : > { %v1012_v54 = vmul.f32 0.7978846, %v1011_v53 }
 0x75e   : > { %1492 = vtanh.f32 %v1012_v54 }
 0x764   : > { %v1493_v55 = vpop.eup %1492 }
 0x765   : > { %v1014_v57 = vadd.f32 1.0, %v1493_v55 }
 0x767   : > { %v1015_v58 = vmul.f32 %v1014_v57, %v1007_v56 }
 0x769   : > { %v1016_v59 = vpack.c.bf16 %v1015_v58, %v1015_v58 }
 0x76b   : > { %1337 = vmatmul.msk.bf16.vlgmr.msra.gmra.mxu1 %vm891_vm6, %v1016_v59  ;;  %v1055_v60 = vunpack.c.l.b16 %v1016_v59 }
 0x76d   : > { %v1056_v61 = vpack.c.b16 %v1055_v60, %v1055_v60 }
 0x76f   : > { %1057 = vrot.lane.b32.xlu1 %v1056_v61, %s1738_s24  ;;  %s1666_s24 = scalar_lea.hbm %s2089_s10, 16 }
 0x770   : > { %p1668_p8 = scmp.lt.s32.totalorder %s1666_s24, %s1662_s21 }
 0x772   : > { %p1669_p9 = por %p1668_p8, %p1667_p7 }
 0x774   : > { %p1670_p10 = pnand %p1669_p9, %p1665_p12 }
 0x7e1   : > { %v1058_v62 = vpop.permute.xlu1 %1057 }
 0x7e2   : > { %1350 = vmatmul.msk.bf16.vlgmr.msra.gmra.mxu2 %vm891_vm6, %v1058_v62 }
 0x7e8   : > { %v1045_v63 = vpop.f32.mrf.mxu1 }
 0x7f0   : > { %v1047_v1 = vpop.f32.mrf.mxu1 }
 0x865   : > { %v1083_v2 = vpop.f32.mrf.mxu2 }
 0x866   : > { %1088 = vrot.lane.b32.xlu1 %v1083_v2, %s1731_s6  ;;  %s1266_s6 = sshll.u32 %s1912_s18, 3 }
 0x867   : > { %s451_s19 = scalar_lea.vmem [#allocation12], %s1266_s6 }
 0x868   : > { %s1135_s11 = sshll.u32 %s451_s19, 4  ;;  %s1136_s11 = int_to_ptr.vmem [resolvable:$true] %s1135_s11 }
 0x86d   : > { %v1085_v3 = vpop.f32.mrf.mxu2 }
 0x8d8   : > { %v1089_v5 = vpop.permute.xlu1 %1088 }
 0x8d9   : > { %v1091_v6 = vsel %vm470_vm0, %v1045_v63, %v1089_v5 }
 0x8da   : > { %v1093_v7 = vadd.f32 %v1092_v4, %v1091_v6 }
 0x8dc   : > { %v1094_v8 = vadd.f32 %v1093_v7, %v941_v33 }
 0x8de   : > { %v1095_v9 = vsel %vm891_vm6, %v1094_v8, 0.0 }
 0x8df   : > { %1096 = vadd.xlane.f32.xlu0 %v1095_v9 }
 0x952   : > { %v1097_v10 = vpop.xlane.xlu0 %1096 }
 0x953   : > { %v1098_v12 = vmul.f32 %v1097_v10, %v2008_v11 }
 0x955   : > { %v1099_v13 = vsub.f32 %v1094_v8, %v1098_v12 }
 0x957   : > { %v1100_v14 = vmul.f32 %v1099_v13, %v1099_v13 }
 0x959   : > { %v1101_v15 = vsel %vm891_vm6, %v1100_v14, 0.0 }
 0x95a   : > { %1102 = vadd.xlane.f32.xlu1 %v1101_v15 }
 0x9cd   : > { %v1103_v0 = vpop.xlane.xlu1 %1102 }
 0x9ce   : > { %v1104_v16 = vmul.f32 %v1103_v0, %v2008_v11 }
 0x9d0   : > { %v1105_v17 = vadd.f32 1e-12, %v1104_v16 }
 0x9d2   : > { %1494 = vrsqrt.f32 %v1105_v17  ;;  %vm1112_vm12 = vweird.f32 %v1105_v17 }
 0x9d8   : > { %v1495_v18 = vpop.eup %1494 }
 0x9d9   : > { %v1107_v19 = vmul.f32 %v1495_v18, %v1105_v17  ;;  %vm1113_vm11 = vweird.f32 %v1495_v18 }
 0x9da   : > { %vm1114_vm13 = vmor %vm1112_vm12, %vm1113_vm11 }
 0x9db   : > { %v1108_v20 = vmul.f32 %v1495_v18, %v1107_v19 }
 0x9dd   : > { %v1109_v22 = vmul.f32 0.5, %v1108_v20 }
 0x9df   : > { %v1110_v23 = vsub.f32 1.5, %v1109_v22 }
 0x9e1   : > { %v1111_v24 = vmul.f32 %v1495_v18, %v1110_v23 }
 0x9e3   : > { %v1115_v11 = vsel %vm1114_vm13, %v1495_v18, %v1111_v24 }
 0x9e4   : > { %v1116_v26 = vmul.f32 %v1115_v11, %v1099_v13 }
 0x9e6   : > { %v1118_v28 = vmul.f32 %v1117_v25, %v1116_v26 }
 0x9e8   : > { %v1120_v29 = vadd.f32 %v1471_v27, %v1118_v28 }
 0x9ea   : > { %1121 = vst.msk [vmem:[%s451_s19] sm:$0xff] %vm891_vm6, %v1120_v29 }
 0x9eb   : > { %1673 = shalt.err (!%p1670_p10)
}
 0x9ec   : > { %1387 = dma.vmem_to_hbm [thread:$0]  (%p1881_p4), %s1136_s11, 128, %s1138_s4, %s1123_s20  }
 0x9ed PF: > { %s1149_s18 = sand.u32 1, %s1708_s13   ;;  %p2103_p13 = scmp.ge.s32.totalorder %s1720_s16, 2 }
 0x9ee   : > { %s1150_s12 = scalar_lea.sflag [#allocation5], %s1149_s18 }
 0x9ef   : > { %p1407_p11 = pnand %p2103_p13, %p1885_p6 }
 0x9f1   : > { %p1408_p0 = pneg %p1407_p11 }
 0x9f3   : > { %1703 = dma.done.wait (%p1408_p0), %s1150_s12, 128  }
 0x9f4   : > { %1705 = vsyncadd (%p1408_p0), %s1150_s12, 4294967168  ;;  %p25_p2 = scmp.ge.s32.totalorder %s1855_s22, 4   ;;  %s2104_s13 = smov %s1712_s14 }
 0x9f5   : > { %s2105_s14 = smov %s1716_s15  ;;  %s2106_s15 = smov %s1866_s30 }
 0x9f6   : > { %s2107_s16 = smov %s1855_s22  ;;  %27 = sbr.rel (!%p25_p2) target bundleno = 11 (0xb), region = 129 }
 0x9fb   :  { %1156 = vsyncpa [#allocation4], 1 }
 0x9fc   :  { %1158 = vsyncpa [#allocation4 + $0x1], 1 }
 0x9fd   :  { %1159 = vsyncpa [#allocation7], 1 }
 0x9fe   :  { %1160 = vsyncpa [#allocation10], 1 }
 0x9ff   :  { %1161 = vsyncpa [#allocation5], 1 }
 0xa00   :  { %1163 = vsyncpa [#allocation5 + $0x1], 1 }

</bundles_post_ra>
